<compile_context>
chip_gen: v7x
topology: tpu7x:2x2x1
jax: 0.10.0
libtpu: 0.0.40
codegen_flags: <defaults>
</compile_context>

<pallas_src>
import functools
import jax
import jax.numpy as jnp
from jax.experimental import pallas as pl
from jax.experimental.pallas import tpu as pltpu

LANE = 128          # lane width (last-dim alignment)
BF16_SUBLANE = 16   # bf16 sublane tile height -> batch tile must be a multiple of 16
_NEG_BIG = -1e30    # finite "-inf" for masking padded logit columns


def _round_up(x, m):
    return ((x + m - 1) // m) * m


# ----------------------------------------------------------------------------- kernel
def _mlp_fused_kernel(x_ref, *rest, n_layers, out_dim):
    """rest = (w0, b0, w1, b1, ..., w_{L-1}, b_{L-1}, o_ref).

    Computes the whole MLP for one batch tile entirely in VMEM/vregs:
      h = x; h = relu(h @ Wi + bi) ...; y = h @ W_last + b_last; out = log_softmax(y).
    """
    o_ref = rest[-1]
    wb = rest[:-1]

    h = x_ref[...]                                # already bf16 (pre-cast in wrapper)
    for i in range(n_layers):
        w = wb[2 * i][...]                        # bf16 (Kp, Np), zero-padded
        b = wb[2 * i + 1][...]                    # f32  (1, Np), zero-padded
        y = jnp.dot(h, w, preferred_element_type=jnp.float32) + b  # f32 accumulation
        if i < n_layers - 1:
            h = jnp.maximum(y, 0.0).astype(jnp.bfloat16)           # ReLU, back to bf16
        else:
            # Mask padded logit columns so they cannot affect the row-wise log_softmax.
            col = jax.lax.broadcasted_iota(jnp.int32, y.shape, 1)
            y = jnp.where(col < out_dim, y, jnp.full_like(y, _NEG_BIG))
            m = jnp.max(y, axis=1, keepdims=True)
            z = y - m
            lse = jnp.log(jnp.sum(jnp.exp(z), axis=1, keepdims=True))
            o_ref[...] = (z - lse).astype(o_ref.dtype)


# ----------------------------------------------------------------------------- params
def prepare_mlp_params(params, in_dim):
    """Pad + bf16-cast weights ONCE (reuse across forward calls).

    params: list of (w, b), w: (in_features, out_features), b: (1, out_features).
    Returns (flat_wb, dims_p, padded_shapes).
    """
    dims = [in_dim] + [w.shape[1] for (w, _) in params]
    dims_p = [_round_up(d, LANE) for d in dims]

    flat_wb = []
    padded_shapes = []
    for i, (w, b) in enumerate(params):
        Kp, Np = dims_p[i], dims_p[i + 1]
        w_p = jnp.zeros((Kp, Np), jnp.float32).at[: w.shape[0], : w.shape[1]].set(w)
        b_p = jnp.zeros((1, Np), jnp.float32).at[:, : b.shape[1]].set(b)
        flat_wb += [w_p.astype(jnp.bfloat16), b_p]   # weights bf16, bias stays f32
        padded_shapes.append((Kp, Np))
    return flat_wb, dims_p, padded_shapes


def _choose_tm(batch):
    """Batch tile: as large as useful (<=256), multiple of 16 (bf16 sublanes),
    and keep the parallel batch grid >= 2 steps when batch allows (v7x megacore)."""
    Bp0 = _round_up(max(batch, BF16_SUBLANE), BF16_SUBLANE)
    tm = min(256, Bp0)
    tm = max(BF16_SUBLANE, (tm // BF16_SUBLANE) * BF16_SUBLANE)
    if Bp0 // tm < 2 and Bp0 >= 2 * BF16_SUBLANE:
        tm = max(BF16_SUBLANE, ((Bp0 // 2) // BF16_SUBLANE) * BF16_SUBLANE)
    Bp = _round_up(Bp0, tm)
    return tm, Bp


def _vmem_limit_bytes(tm, dims_p, padded_shapes, single_buffer_weights):
    """Size the scoped-VMEM request from actual buffer sizes, capped below physical VMEM."""
    wbuf = 1 if single_buffer_weights else 2
    w_bytes = sum(Kp * Np * 2 + Np * 4 for (Kp, Np) in padded_shapes) * wbuf
    io_bytes = 2 * (tm * dims_p[0] * 2) + 2 * (tm * dims_p[-1] * 4)   # x / out double buffers
    act_bytes = 4 * (tm * max(dims_p) * 4)                            # f32 intermediates / spills
    est = w_bytes + io_bytes + act_bytes
    try:
        cap = int(pltpu.get_tpu_info().vmem_capacity_bytes)
    except Exception:
        cap = 64 * 1024 * 1024          # v7x has the smallest physical VMEM per TC
    return int(min(max(2 * est, 16 * 1024 * 1024), int(0.75 * cap)))


# ----------------------------------------------------------------------------- forward
def mlp_forward_pallas(prepared, x, in_dim, out_dim, *, tm=None):
    """Equivalent of MLP.forward: view(-1, in_dim) -> Linear/ReLU stack -> log_softmax(dim=1).

    prepared: output of prepare_mlp_params(params, in_dim).
    """
    flat_wb, dims_p, padded_shapes = prepared
    n_layers = len(padded_shapes)

    h = x.reshape(-1, in_dim)
    B = h.shape[0]
    if tm is None:
        tm, Bp = _choose_tm(B)
    else:
        Bp = _round_up(max(B, tm), tm)

    # Pad batch + input features; pre-cast to bf16 (halves x DMA bytes, no in-kernel cast).
    x_p = jnp.zeros((Bp, dims_p[0]), jnp.bfloat16).at[:B, :in_dim].set(
        h.astype(jnp.bfloat16)
    )

    grid = (Bp // tm,)

    flops = 2 * Bp * sum(dims_p[i] * dims_p[i + 1] for i in range(n_layers))
    bytes_accessed = (
        x_p.size * 2
        + sum(Kp * Np * 2 + Np * 4 for (Kp, Np) in padded_shapes)
        + Bp * dims_p[-1] * 4
    )
    cost = pl.CostEstimate(
        flops=flops, transcendentals=Bp * dims_p[-1], bytes_accessed=bytes_accessed
    )
    kern = functools.partial(_mlp_fused_kernel, n_layers=n_layers, out_dim=out_dim)

    # TODO(synk): for MLPs whose padded bf16 weight stack exceeds ~half of VMEM (v7x: 64 MiB/TC),
    # add an N-tiled / pltpu.emit_pipeline streamed-weight path instead of the all-resident one.

    def _run(single_buffer_weights):
        w_kwargs = (
            {"pipeline_mode": pl.Buffered(buffer_count=1)} if single_buffer_weights else {}
        )
        in_specs = [pl.BlockSpec((tm, dims_p[0]), lambda i: (i, 0))]   # x: batch-tiled
        for (Kp, Np) in padded_shapes:
            in_specs.append(pl.BlockSpec((Kp, Np), lambda i: (0, 0), **w_kwargs))  # W resident
            in_specs.append(pl.BlockSpec((1, Np), lambda i: (0, 0), **w_kwargs))   # b resident
        out_specs = pl.BlockSpec((tm, dims_p[-1]), lambda i: (i, 0))

        return pl.pallas_call(
            kern,
            out_shape=jax.ShapeDtypeStruct((Bp, dims_p[-1]), jnp.float32),
            grid=grid,
            in_specs=in_specs,
            out_specs=out_specs,
            compiler_params=pltpu.CompilerParams(
                dimension_semantics=("parallel",),   # batch axis -> megacore on v7x
                vmem_limit_bytes=_vmem_limit_bytes(
                    tm, dims_p, padded_shapes, single_buffer_weights
                ),
            ),
            cost_estimate=cost,
        )(x_p, *flat_wb)

    try:
        out_p = _run(single_buffer_weights=True)
    except Exception:
        # Fallback: default (double) buffering if single-buffered resident blocks are rejected.
        out_p = _run(single_buffer_weights=False)

    return out_p[:B, :out_dim]


# ----------------------------------------------------------------------------- reference / init
def init_mlp_params(key, in_dim, out_dim, hidden_dims, use_bias=True):
    """Deterministic init mimicking nn.Linear: U(-1/sqrt(fan_in), 1/sqrt(fan_in))."""
    dims = [in_dim] + list(hidden_dims) + [out_dim]
    params = []
    for i in range(len(dims) - 1):
        key, kw, kb = jax.random.split(key, 3)
        bound = 1.0 / (dims[i] ** 0.5)
        w = jax.random.uniform(kw, (dims[i], dims[i + 1]), jnp.float32, -bound, bound)
        if use_bias:
            b = jax.random.uniform(kb, (1, dims[i + 1]), jnp.float32, -bound, bound)
        else:
            b = jnp.zeros((1, dims[i + 1]), jnp.float32)
        params.append((w, b))
    return params


def mlp_forward_ref(params, x, in_dim, *, bf16_matmul):
    """Pure-JAX reference. bf16_matmul=True mirrors the kernel's bf16 MXU inputs."""
    h = x.reshape(-1, in_dim).astype(jnp.float32)
    n_layers = len(params)
    for i, (w, b) in enumerate(params):
        if bf16_matmul:
            h = jnp.dot(
                h.astype(jnp.bfloat16), w.astype(jnp.bfloat16),
                preferred_element_type=jnp.float32,
            ) + b
        else:
            h = h @ w + b
        if i != n_layers - 1:
            h = jnp.maximum(h, 0.0)
    return jax.nn.log_softmax(h, axis=1)


if __name__ == "__main__":
    key = jax.random.PRNGKey(0)
    k_param, k_x = jax.random.split(key)

    # Small, module-consistent shapes: in_dim=64, two hidden layers of 32, out_dim=10.
    # batch=64 so the adaptive tile gives a 2-step parallel batch grid (tm=32).
    batch, in_dim, out_dim = 64, 64, 10
    hidden_dims = [32, 32]

    params = init_mlp_params(k_param, in_dim, out_dim, hidden_dims, use_bias=True)
    x = jax.random.normal(k_x, (batch, in_dim), dtype=jnp.float32)

    prepared = prepare_mlp_params(params, in_dim)   # pad + bf16-cast weights ONCE
    out = mlp_forward_pallas(prepared, x, in_dim, out_dim)
    out = jax.block_until_ready(out)
    assert out.shape == (batch, out_dim)

    # Tight check vs. a reference with matched bf16 matmul inputs / f32 accumulation.
    ref_bf16 = mlp_forward_ref(params, x, in_dim, bf16_matmul=True)
    assert jnp.allclose(out, ref_bf16, atol=1e-3, rtol=1e-3), "mismatch vs bf16 reference"

    # Looser sanity check vs. the full-f32 reference (bf16 input rounding only).
    ref_f32 = mlp_forward_ref(params, x, in_dim, bf16_matmul=False)
    assert jnp.allclose(out, ref_f32, atol=5e-2, rtol=5e-2), "mismatch vs f32 reference"

    print("KERNEL_OK")
</pallas_src>

<mosaic_0001>
module attributes {stable_mosaic.version = 11 : i64} {
  func.func @_mlp_fused_kernel(%arg0: i32, %arg1: memref<32x128xbf16, #tpu.memory_space<vmem>>, %arg2: memref<128x128xbf16, #tpu.memory_space<vmem>>, %arg3: memref<1x128xf32, #tpu.memory_space<vmem>>, %arg4: memref<128x128xbf16, #tpu.memory_space<vmem>>, %arg5: memref<1x128xf32, #tpu.memory_space<vmem>>, %arg6: memref<128x128xbf16, #tpu.memory_space<vmem>>, %arg7: memref<1x128xf32, #tpu.memory_space<vmem>>, %arg8: memref<32x128xf32, #tpu.memory_space<vmem>>) attributes {dimension_semantics = [#tpu.dimension_semantics<parallel>], iteration_bounds = array<i64: 2>, scalar_prefetch = 0 : i64, scratch_operands = 0 : i64, tpu.core_type = #tpu.core_type<tc>, window_params = [{transform_indices = @transform_0, window_bounds = array<i64: 32, 128>}, {pipeline_mode = #tpu.pipeline_mode<synchronous>, transform_indices = @transform_1, window_bounds = array<i64: 128, 128>}, {pipeline_mode = #tpu.pipeline_mode<synchronous>, transform_indices = @transform_2, window_bounds = array<i64: 1, 128>}, {pipeline_mode = #tpu.pipeline_mode<synchronous>, transform_indices = @transform_3, window_bounds = array<i64: 128, 128>}, {pipeline_mode = #tpu.pipeline_mode<synchronous>, transform_indices = @transform_4, window_bounds = array<i64: 1, 128>}, {pipeline_mode = #tpu.pipeline_mode<synchronous>, transform_indices = @transform_5, window_bounds = array<i64: 128, 128>}, {pipeline_mode = #tpu.pipeline_mode<synchronous>, transform_indices = @transform_6, window_bounds = array<i64: 1, 128>}, {transform_indices = @transform_7, window_bounds = array<i64: 32, 128>}]} {
    %c0 = arith.constant 0 : index
    %c0_0 = arith.constant 0 : index
    %0 = vector.load %arg1[%c0, %c0_0] : memref<32x128xbf16, #tpu.memory_space<vmem>>, vector<32x128xbf16>
    %c0_1 = arith.constant 0 : index
    %c0_2 = arith.constant 0 : index
    %1 = vector.load %arg2[%c0_1, %c0_2] : memref<128x128xbf16, #tpu.memory_space<vmem>>, vector<128x128xbf16>
    %c0_3 = arith.constant 0 : index
    %c0_4 = arith.constant 0 : index
    %2 = vector.load %arg3[%c0_3, %c0_4] : memref<1x128xf32, #tpu.memory_space<vmem>>, vector<1x128xf32>
    %cst = arith.constant dense<0.000000e+00> : vector<32x128xf32>
    %3 = tpu.matmul %0, %1, %cst {dimension_numbers = #tpu.dot_dimension_numbers<[1], [0], [0], [1], [0, 0, 1, 1], [], []>} : vector<32x128xbf16>, vector<128x128xbf16>, vector<32x128xf32> -> vector<32x128xf32>
    %4 = vector.broadcast %2 : vector<1x128xf32> to vector<32x128xf32>
    %5 = arith.addf %3, %4 : vector<32x128xf32>
    %cst_5 = arith.constant 0.000000e+00 : f32
    %6 = vector.broadcast %cst_5 : f32 to vector<32x128xf32>
    %7 = arith.maximumf %5, %6 : vector<32x128xf32>
    %8 = arith.truncf %7 : vector<32x128xf32> to vector<32x128xbf16>
    %c0_6 = arith.constant 0 : index
    %c0_7 = arith.constant 0 : index
    %9 = vector.load %arg4[%c0_6, %c0_7] : memref<128x128xbf16, #tpu.memory_space<vmem>>, vector<128x128xbf16>
    %c0_8 = arith.constant 0 : index
    %c0_9 = arith.constant 0 : index
    %10 = vector.load %arg5[%c0_8, %c0_9] : memref<1x128xf32, #tpu.memory_space<vmem>>, vector<1x128xf32>
    %cst_10 = arith.constant dense<0.000000e+00> : vector<32x128xf32>
    %11 = tpu.matmul %8, %9, %cst_10 {dimension_numbers = #tpu.dot_dimension_numbers<[1], [0], [0], [1], [0, 0, 1, 1], [], []>} : vector<32x128xbf16>, vector<128x128xbf16>, vector<32x128xf32> -> vector<32x128xf32>
    %12 = vector.broadcast %10 : vector<1x128xf32> to vector<32x128xf32>
    %13 = arith.addf %11, %12 : vector<32x128xf32>
    %cst_11 = arith.constant 0.000000e+00 : f32
    %14 = vector.broadcast %cst_11 : f32 to vector<32x128xf32>
    %15 = arith.maximumf %13, %14 : vector<32x128xf32>
    %16 = arith.truncf %15 : vector<32x128xf32> to vector<32x128xbf16>
    %c0_12 = arith.constant 0 : index
    %c0_13 = arith.constant 0 : index
    %17 = vector.load %arg6[%c0_12, %c0_13] : memref<128x128xbf16, #tpu.memory_space<vmem>>, vector<128x128xbf16>
    %c0_14 = arith.constant 0 : index
    %c0_15 = arith.constant 0 : index
    %18 = vector.load %arg7[%c0_14, %c0_15] : memref<1x128xf32, #tpu.memory_space<vmem>>, vector<1x128xf32>
    %cst_16 = arith.constant dense<0.000000e+00> : vector<32x128xf32>
    %19 = tpu.matmul %16, %17, %cst_16 {dimension_numbers = #tpu.dot_dimension_numbers<[1], [0], [0], [1], [0, 0, 1, 1], [], []>} : vector<32x128xbf16>, vector<128x128xbf16>, vector<32x128xf32> -> vector<32x128xf32>
    %20 = vector.broadcast %18 : vector<1x128xf32> to vector<32x128xf32>
    %21 = arith.addf %19, %20 : vector<32x128xf32>
    %22 = tpu.iota {dimensions = array<i32: 1>} : vector<32x128xi32>
    %c10_i32 = arith.constant 10 : i32
    %23 = vector.broadcast %c10_i32 : i32 to vector<32x128xi32>
    %24 = arith.cmpi slt, %22, %23 : vector<32x128xi32>
    %cst_17 = arith.constant -1.000000e+30 : f32
    %25 = vector.broadcast %cst_17 : f32 to vector<32x128xf32>
    %26 = arith.select %24, %21, %25 : vector<32x128xi1>, vector<32x128xf32>
    %cst_18 = arith.constant dense<0xFF800000> : vector<32xf32>
    %27 = vector.multi_reduction <maximumf>, %26, %cst_18 [1] : vector<32x128xf32> to vector<32xf32>
    %28 = vector.shape_cast %27 : vector<32xf32> to vector<32x1xf32>
    %29 = vector.broadcast %28 : vector<32x1xf32> to vector<32x128xf32>
    %30 = arith.subf %26, %29 : vector<32x128xf32>
    %31 = math.exp %30 : vector<32x128xf32>
    %cst_19 = arith.constant dense<0.000000e+00> : vector<32xf32>
    %32 = vector.multi_reduction <add>, %31, %cst_19 [1] : vector<32x128xf32> to vector<32xf32>
    %33 = vector.shape_cast %32 : vector<32xf32> to vector<32x1xf32>
    %34 = math.log %33 : vector<32x1xf32>
    %35 = vector.broadcast %34 : vector<32x1xf32> to vector<32x128xf32>
    %36 = arith.subf %30, %35 : vector<32x128xf32>
    %c0_20 = arith.constant 0 : index
    %c0_21 = arith.constant 0 : index
    %37 = vector.load %arg8[%c0_20, %c0_21] : memref<32x128xf32, #tpu.memory_space<vmem>>, vector<32x128xf32>
    tpu.vector_store %arg8[%c0_20, %c0_21], %36 {strides = array<i32>} : memref<32x128xf32, #tpu.memory_space<vmem>>, vector<32x128xf32>,
    return
  }
  func.func @transform_0(%arg0: i32) -> (i32, i32) {
    %c0_i32 = arith.constant 0 : i32
    %c0_i32_0 = arith.constant 0 : i32
    return %arg0, %c0_i32 : i32, i32
  }
  func.func @transform_1(%arg0: i32) -> (i32, i32) {
    %c0_i32 = arith.constant 0 : i32
    %c0_i32_0 = arith.constant 0 : i32
    %c0_i32_1 = arith.constant 0 : i32
    return %c0_i32, %c0_i32_0 : i32, i32
  }
  func.func @transform_2(%arg0: i32) -> (i32, i32) {
    %c0_i32 = arith.constant 0 : i32
    %c0_i32_0 = arith.constant 0 : i32
    %c0_i32_1 = arith.constant 0 : i32
    return %c0_i32, %c0_i32_0 : i32, i32
  }
  func.func @transform_3(%arg0: i32) -> (i32, i32) {
    %c0_i32 = arith.constant 0 : i32
    %c0_i32_0 = arith.constant 0 : i32
    %c0_i32_1 = arith.constant 0 : i32
    return %c0_i32, %c0_i32_0 : i32, i32
  }
  func.func @transform_4(%arg0: i32) -> (i32, i32) {
    %c0_i32 = arith.constant 0 : i32
    %c0_i32_0 = arith.constant 0 : i32
    %c0_i32_1 = arith.constant 0 : i32
    return %c0_i32, %c0_i32_0 : i32, i32
  }
  func.func @transform_5(%arg0: i32) -> (i32, i32) {
    %c0_i32 = arith.constant 0 : i32
    %c0_i32_0 = arith.constant 0 : i32
    %c0_i32_1 = arith.constant 0 : i32
    return %c0_i32, %c0_i32_0 : i32, i32
  }
  func.func @transform_6(%arg0: i32) -> (i32, i32) {
    %c0_i32 = arith.constant 0 : i32
    %c0_i32_0 = arith.constant 0 : i32
    %c0_i32_1 = arith.constant 0 : i32
    return %c0_i32, %c0_i32_0 : i32, i32
  }
  func.func @transform_7(%arg0: i32) -> (i32, i32) {
    %c0_i32 = arith.constant 0 : i32
    %c0_i32_0 = arith.constant 0 : i32
    return %arg0, %c0_i32 : i32, i32
  }
}

module attributes {stable_mosaic.version = 11 : i64} {
  func.func @_mlp_fused_kernel(%arg0: i32, %arg1: memref<32x128xbf16, #tpu.memory_space<vmem>>, %arg2: memref<128x128xbf16, #tpu.memory_space<vmem>>, %arg3: memref<1x128xf32, #tpu.memory_space<vmem>>, %arg4: memref<128x128xbf16, #tpu.memory_space<vmem>>, %arg5: memref<1x128xf32, #tpu.memory_space<vmem>>, %arg6: memref<128x128xbf16, #tpu.memory_space<vmem>>, %arg7: memref<1x128xf32, #tpu.memory_space<vmem>>, %arg8: memref<32x128xf32, #tpu.memory_space<vmem>>) attributes {dimension_semantics = [#tpu.dimension_semantics<parallel>], iteration_bounds = array<i64: 2>, scalar_prefetch = 0 : i64, scratch_operands = 0 : i64, tpu.core_type = #tpu.core_type<tc>, window_params = [{transform_indices = @transform_0, window_bounds = array<i64: 32, 128>}, {pipeline_mode = #tpu.pipeline_mode<synchronous>, transform_indices = @transform_1, window_bounds = array<i64: 128, 128>}, {pipeline_mode = #tpu.pipeline_mode<synchronous>, transform_indices = @transform_2, window_bounds = array<i64: 1, 128>}, {pipeline_mode = #tpu.pipeline_mode<synchronous>, transform_indices = @transform_3, window_bounds = array<i64: 128, 128>}, {pipeline_mode = #tpu.pipeline_mode<synchronous>, transform_indices = @transform_4, window_bounds = array<i64: 1, 128>}, {pipeline_mode = #tpu.pipeline_mode<synchronous>, transform_indices = @transform_5, window_bounds = array<i64: 128, 128>}, {pipeline_mode = #tpu.pipeline_mode<synchronous>, transform_indices = @transform_6, window_bounds = array<i64: 1, 128>}, {transform_indices = @transform_7, window_bounds = array<i64: 32, 128>}]} {
    %c0 = arith.constant 0 : index
    %c0_0 = arith.constant 0 : index
    %0 = vector.load %arg1[%c0, %c0_0] : memref<32x128xbf16, #tpu.memory_space<vmem>>, vector<32x128xbf16>
    %c0_1 = arith.constant 0 : index
    %c0_2 = arith.constant 0 : index
    %1 = vector.load %arg2[%c0_1, %c0_2] : memref<128x128xbf16, #tpu.memory_space<vmem>>, vector<128x128xbf16>
    %c0_3 = arith.constant 0 : index
    %c0_4 = arith.constant 0 : index
    %2 = vector.load %arg3[%c0_3, %c0_4] : memref<1x128xf32, #tpu.memory_space<vmem>>, vector<1x128xf32>
    %cst = arith.constant dense<0.000000e+00> : vector<32x128xf32>
    %3 = tpu.matmul %0, %1, %cst {dimension_numbers = #tpu.dot_dimension_numbers<[1], [0], [0], [1], [0, 0, 1, 1], [], []>} : vector<32x128xbf16>, vector<128x128xbf16>, vector<32x128xf32> -> vector<32x128xf32>
    %4 = vector.broadcast %2 : vector<1x128xf32> to vector<32x128xf32>
    %5 = arith.addf %3, %4 : vector<32x128xf32>
    %cst_5 = arith.constant 0.000000e+00 : f32
    %6 = vector.broadcast %cst_5 : f32 to vector<32x128xf32>
    %7 = arith.maximumf %5, %6 : vector<32x128xf32>
    %8 = arith.truncf %7 : vector<32x128xf32> to vector<32x128xbf16>
    %c0_6 = arith.constant 0 : index
    %c0_7 = arith.constant 0 : index
    %9 = vector.load %arg4[%c0_6, %c0_7] : memref<128x128xbf16, #tpu.memory_space<vmem>>, vector<128x128xbf16>
    %c0_8 = arith.constant 0 : index
    %c0_9 = arith.constant 0 : index
    %10 = vector.load %arg5[%c0_8, %c0_9] : memref<1x128xf32, #tpu.memory_space<vmem>>, vector<1x128xf32>
    %cst_10 = arith.constant dense<0.000000e+00> : vector<32x128xf32>
    %11 = tpu.matmul %8, %9, %cst_10 {dimension_numbers = #tpu.dot_dimension_numbers<[1], [0], [0], [1], [0, 0, 1, 1], [], []>} : vector<32x128xbf16>, vector<128x128xbf16>, vector<32x128xf32> -> vector<32x128xf32>
    %12 = vector.broadcast %10 : vector<1x128xf32> to vector<32x128xf32>
    %13 = arith.addf %11, %12 : vector<32x128xf32>
    %cst_11 = arith.constant 0.000000e+00 : f32
    %14 = vector.broadcast %cst_11 : f32 to vector<32x128xf32>
    %15 = arith.maximumf %13, %14 : vector<32x128xf32>
    %16 = arith.truncf %15 : vector<32x128xf32> to vector<32x128xbf16>
    %c0_12 = arith.constant 0 : index
    %c0_13 = arith.constant 0 : index
    %17 = vector.load %arg6[%c0_12, %c0_13] : memref<128x128xbf16, #tpu.memory_space<vmem>>, vector<128x128xbf16>
    %c0_14 = arith.constant 0 : index
    %c0_15 = arith.constant 0 : index
    %18 = vector.load %arg7[%c0_14, %c0_15] : memref<1x128xf32, #tpu.memory_space<vmem>>, vector<1x128xf32>
    %cst_16 = arith.constant dense<0.000000e+00> : vector<32x128xf32>
    %19 = tpu.matmul %16, %17, %cst_16 {dimension_numbers = #tpu.dot_dimension_numbers<[1], [0], [0], [1], [0, 0, 1, 1], [], []>} : vector<32x128xbf16>, vector<128x128xbf16>, vector<32x128xf32> -> vector<32x128xf32>
    %20 = vector.broadcast %18 : vector<1x128xf32> to vector<32x128xf32>
    %21 = arith.addf %19, %20 : vector<32x128xf32>
    %22 = tpu.iota {dimensions = array<i32: 1>} : vector<32x128xi32>
    %c10_i32 = arith.constant 10 : i32
    %23 = vector.broadcast %c10_i32 : i32 to vector<32x128xi32>
    %24 = arith.cmpi slt, %22, %23 : vector<32x128xi32>
    %cst_17 = arith.constant -1.000000e+30 : f32
    %25 = vector.broadcast %cst_17 : f32 to vector<32x128xf32>
    %26 = arith.select %24, %21, %25 : vector<32x128xi1>, vector<32x128xf32>
    %cst_18 = arith.constant dense<0xFF800000> : vector<32xf32>
    %27 = vector.multi_reduction <maximumf>, %26, %cst_18 [1] : vector<32x128xf32> to vector<32xf32>
    %28 = vector.shape_cast %27 : vector<32xf32> to vector<32x1xf32>
    %29 = vector.broadcast %28 : vector<32x1xf32> to vector<32x128xf32>
    %30 = arith.subf %26, %29 : vector<32x128xf32>
    %31 = math.exp %30 : vector<32x128xf32>
    %cst_19 = arith.constant dense<0.000000e+00> : vector<32xf32>
    %32 = vector.multi_reduction <add>, %31, %cst_19 [1] : vector<32x128xf32> to vector<32xf32>
    %33 = vector.shape_cast %32 : vector<32xf32> to vector<32x1xf32>
    %34 = math.log %33 : vector<32x1xf32>
    %35 = vector.broadcast %34 : vector<32x1xf32> to vector<32x128xf32>
    %36 = arith.subf %30, %35 : vector<32x128xf32>
    %c0_20 = arith.constant 0 : index
    %c0_21 = arith.constant 0 : index
    %37 = vector.load %arg8[%c0_20, %c0_21] : memref<32x128xf32, #tpu.memory_space<vmem>>, vector<32x128xf32>
    tpu.vector_store %arg8[%c0_20, %c0_21], %36 {strides = array<i32>} : memref<32x128xf32, #tpu.memory_space<vmem>>, vector<32x128xf32>,
    return
  }
  func.func @transform_0(%arg0: i32) -> (i32, i32) {
    %c0_i32 = arith.constant 0 : i32
    %c0_i32_0 = arith.constant 0 : i32
    return %arg0, %c0_i32 : i32, i32
  }
  func.func @transform_1(%arg0: i32) -> (i32, i32) {
    %c0_i32 = arith.constant 0 : i32
    %c0_i32_0 = arith.constant 0 : i32
    %c0_i32_1 = arith.constant 0 : i32
    return %c0_i32, %c0_i32_0 : i32, i32
  }
  func.func @transform_2(%arg0: i32) -> (i32, i32) {
    %c0_i32 = arith.constant 0 : i32
    %c0_i32_0 = arith.constant 0 : i32
    %c0_i32_1 = arith.constant 0 : i32
    return %c0_i32, %c0_i32_0 : i32, i32
  }
  func.func @transform_3(%arg0: i32) -> (i32, i32) {
    %c0_i32 = arith.constant 0 : i32
    %c0_i32_0 = arith.constant 0 : i32
    %c0_i32_1 = arith.constant 0 : i32
    return %c0_i32, %c0_i32_0 : i32, i32
  }
  func.func @transform_4(%arg0: i32) -> (i32, i32) {
    %c0_i32 = arith.constant 0 : i32
    %c0_i32_0 = arith.constant 0 : i32
    %c0_i32_1 = arith.constant 0 : i32
    return %c0_i32, %c0_i32_0 : i32, i32
  }
  func.func @transform_5(%arg0: i32) -> (i32, i32) {
    %c0_i32 = arith.constant 0 : i32
    %c0_i32_0 = arith.constant 0 : i32
    %c0_i32_1 = arith.constant 0 : i32
    return %c0_i32, %c0_i32_0 : i32, i32
  }
  func.func @transform_6(%arg0: i32) -> (i32, i32) {
    %c0_i32 = arith.constant 0 : i32
    %c0_i32_0 = arith.constant 0 : i32
    %c0_i32_1 = arith.constant 0 : i32
    return %c0_i32, %c0_i32_0 : i32, i32
  }
  func.func @transform_7(%arg0: i32) -> (i32, i32) {
    %c0_i32 = arith.constant 0 : i32
    %c0_i32_0 = arith.constant 0 : i32
    return %arg0, %c0_i32 : i32, i32
  }
}

</mosaic_0001>

<bundles_post_ra>
// kernel: tpu_custom_call.1
= control target key start
LH: loop header
LB: loop body
LE: loop exit
PB: predicated region body
PF: predicated region fallthrough
CT: control target
= control target key end

     0   :  { %12 = vsyncpa [#allocation3], 0  ;;  %s1687_s0 = inlined_call_operand.hbm [shape: bf16[64,128], index: 0, kind: input, shape index: {}]   ;;  %s1688_s1 = inlined_call_operand.hbm [shape: bf16[128,128], index: 1, kind: input, shape index: {}]   ;;  %s1689_s2 = inlined_call_operand.vmem [shape: f32[1,128], index: 2, kind: input, shape index: {}]   ;;  %s1690_s3 = inlined_call_operand.hbm [shape: bf16[128,128], index: 3, kind: input, shape index: {}]   ;;  %s1691_s4 = inlined_call_operand.vmem [shape: f32[1,128], index: 4, kind: input, shape index: {}]   ;;  %s1692_s5 = inlined_call_operand.hbm [shape: bf16[128,128], index: 5, kind: input, shape index: {}]   ;;  %s1693_s6 = inlined_call_operand.vmem [shape: f32[1,128], index: 6, kind: input, shape index: {}]   ;;  %s1694_s7 = inlined_call_operand.hbm [shape: f32[64,128], index: 7, kind: output, shape index: {}]  }
   0x1   :  { %14 = vsyncpa [#allocation3 + $0x1], 0 }
   0x2   :  { %15 = vsyncpa [#allocation6], 0 }
   0x3   :  { %16 = vsyncpa [#allocation9], 0 }
   0x4   :  { %17 = vsyncpa [#allocation4], 0 }
   0x5   :  { %19 = vsyncpa [#allocation4 + $0x1], 0  ;;  %s1402_s24 = smov 0   ;;  %s1404_s25 = smov 0  }
   0x6   :  { %s1406_s26 = smov 0   ;;  %s1408_s27 = smov 0  }
   0x7 LB: > { %s1423_s28 = sadd.s32 4294967295, %s1351_s27   ;;  %s899_s29 = sadd.s32 4294967294, %s1351_s27   ;;  %s1351_s27 = sphi %s1408_s27, %s1720_s27   ;;  %s1347_s26 = sphi %s1406_s26, %s1719_s26   ;;  %s1343_s25 = sphi %s1404_s25, %s1718_s25   ;;  %s1339_s24 = sphi %s1402_s24, %s1717_s24  }
   0x8   : > { %p45_p0 = scmp.ne.s32.totalorder %s1343_s25, %s1339_s24  ;;  %p1695_p1 = scmp.eq.s32.totalorder %s1423_s28, 0 }
   0x9   : > { %p201_p3 = scmp.eq.s32.totalorder %s899_s29, 1  ;;  %p900_p5 = scmp.ge.s32.totalorder %s1351_s27, 1 }
   0xa   : > { %p1432_p4 = por %p1695_p1, %p45_p0  ;;  %p208_p7 = scmp.lt.s32.totalorder %s1351_s27, 3 }
   0xb   : > { %p1437_p6 = por %p201_p3, %p45_p0  ;;  %s1353_s10 = smov [#allocation5]  }
   0xc   : > { %s1699_s30 = scalar_select %p1432_p4, 1, 0 }
   0xd   : > { %s1700_s8 = scalar_select %p1437_p6, 1, 0 }
   0xe   : > { %p1442_p8 = pnand %p900_p5, %p208_p7  ;;  %s220_s11 = sshll.u32 %s1353_s10, 4  ;;  %s1446_s11 = int_to_ptr.vmem [resolvable:$true] %s220_s11 }
   0xf   : > { %1701 = sst [smem:[#allocation15_spill]] %s1700_s8  ;;  %s1354_s13 = smov [#allocation7]  }
  0x10   : > { %s1702_s9 = scalar_select %p1442_p8, 1, 0 }
  0x11   : > { %p1056_p9 = pneg %p1442_p8  ;;  %s236_s14 = sshll.u32 %s1354_s13, 4  ;;  %s1457_s14 = int_to_ptr.vmem [resolvable:$true] %s236_s14 }
  0x12   : > { %s1355_s15 = smov [#allocation8]   ;;  %s1163_s19 = scalar_lea.hbm %s1688_s1, 1024 }
  0x13   : > { %p1453_p11 = pnand %p1056_p9, %p1695_p1  ;;  %s1459_s16 = sshll.u32 %s1355_s15, 4  ;;  %s253_s16 = int_to_ptr.vmem [resolvable:$true] %s1459_s16 }
  0x14   : > { %p1164_p12 = scmp.ne.s32.totalorder %s1688_s1, %s1163_s19  ;;  %p1170_p5 = scmp.lt.u32.totalorder %s1163_s19, %s1688_s1 }
  0x15   : > { %p1469_p13 = pneg %p1453_p11 }
  0x17   : > { %p1166_p0 = pnand %p1469_p13, %p1164_p12 }
  0x19   : > { %p1167_p3 = pneg %p1166_p0 }
  0x1b   : > { %p1172_p7 = pnand %p1170_p5, %p1167_p3 }
  0x1d   : > { %1175 = shalt.err (!%p1172_p7)
}
  0x1e   : > { %s1176_s10 = scalar_lea.vmem %s1446_s11, 1024  ;;  %p1184_p2 = scmp.lt.s32.totalorder %s1446_s11, %s1446_s11 }
  0x1f   : > { %p1177_p9 = scmp.ne.s32.totalorder %s1446_s11, %s1176_s10  ;;  %p1185_p6 = scmp.lt.s32.totalorder %s1176_s10, %s1176_s10 }
  0x21   : > { %p1179_p10 = pnand %p1177_p9, %p1469_p13  ;;  %p1186_p12 = por %p1185_p6, %p1184_p2 }
  0x23   : > { %p1180_p1 = pneg %p1179_p10 }
  0x25   : > { %p1187_p0 = pnand %p1186_p12, %p1180_p1 }
  0x27   : > { %1190 = shalt.err (!%p1187_p0)
}
  0x28   : > { %s1356_s13 = smov 64   ;;  %s1357_s15 = smov 4  }
  0x29   : > { %1059 = dma.hbm_to_vmem [thread:$0]  (!%p1453_p11), %s1688_s1, 1024, %s1446_s11, [#allocation6], %s1356_s13, %s1356_s13, %s1357_s15  }
  0x2a   : > { %s1191_s21 = scalar_lea.hbm %s1690_s3, 1024 }
  0x2b   : > { %p1192_p1 = scmp.ne.s32.totalorder %s1690_s3, %s1191_s21  ;;  %p1198_p10 = scmp.lt.u32.totalorder %s1191_s21, %s1690_s3 }
  0x2d   : > { %p1194_p2 = pnand %p1192_p1, %p1469_p13 }
  0x2f   : > { %p1195_p6 = pneg %p1194_p2 }
  0x31   : > { %p1200_p3 = pnand %p1198_p10, %p1195_p6 }
  0x33   : > { %1203 = shalt.err (!%p1200_p3)
}
  0x34   : > { %s1204_s11 = scalar_lea.vmem %s1457_s14, 1024  ;;  %p1212_p12 = scmp.lt.s32.totalorder %s1457_s14, %s1457_s14 }
  0x35   : > { %p1205_p5 = scmp.ne.s32.totalorder %s1457_s14, %s1204_s11  ;;  %p1213_p0 = scmp.lt.s32.totalorder %s1204_s11, %s1204_s11 }
  0x37   : > { %p1207_p7 = pnand %p1205_p5, %p1469_p13  ;;  %p1214_p1 = por %p1213_p0, %p1212_p12 }
  0x39   : > { %p1208_p9 = pneg %p1207_p7 }
  0x3b   : > { %p1215_p2 = pnand %p1214_p1, %p1208_p9 }
  0x3d   : > { %1218 = shalt.err (!%p1215_p2)
}
  0x3e   : > { %1062 = dma.hbm_to_vmem [thread:$0]  (!%p1453_p11), %s1690_s3, 1024, %s1457_s14, [#allocation6], %s1356_s13, %s1356_s13, %s1357_s15  }
  0x3f   : > { %s1219_s20 = scalar_lea.hbm %s1692_s5, 1024 }
  0x40   : > { %p1220_p6 = scmp.ne.s32.totalorder %s1692_s5, %s1219_s20  ;;  %p1226_p5 = scmp.lt.u32.totalorder %s1219_s20, %s1692_s5 }
  0x42   : > { %p1222_p10 = pnand %p1220_p6, %p1469_p13 }
  0x44   : > { %p1223_p3 = pneg %p1222_p10 }
  0x46   : > { %p1228_p7 = pnand %p1226_p5, %p1223_p3 }
  0x48   : > { %1231 = shalt.err (!%p1228_p7)
}
  0x49   : > { %s1232_s11 = scalar_lea.vmem %s253_s16, 1024  ;;  %p1240_p1 = scmp.lt.s32.totalorder %s253_s16, %s253_s16 }
  0x4a   : > { %p1233_p9 = scmp.ne.s32.totalorder %s253_s16, %s1232_s11  ;;  %p1241_p2 = scmp.lt.s32.totalorder %s1232_s11, %s1232_s11 }
  0x4c   : > { %p1235_p12 = pnand %p1233_p9, %p1469_p13  ;;  %p1242_p4 = por %p1241_p2, %p1240_p1 }
  0x4e   : > { %p1236_p0 = pneg %p1235_p12 }
  0x50   : > { %p1243_p8 = pnand %p1242_p4, %p1236_p0 }
  0x52   : > { %1246 = shalt.err (!%p1243_p8)
}
  0x53   : > { %1065 = dma.hbm_to_vmem [thread:$0]  (!%p1453_p11), %s1692_s5, 1024, %s253_s16, [#allocation9], %s1356_s13, %s1356_s13, %s1357_s15  }
  0x54   : > { %s1542_s22 = sadd.s32 1, %s1351_s27   ;;  %s32_s17 = sadd.s32 1, %s1347_s26 }
  0x55   : > { %s29_s12 = ssub.s32 %s1351_s27, %s1542_s22  ;;  %p39_p8 = scmp.ne.s32.totalorder %s1347_s26, %s1343_s25 }
  0x56   : > { %p30_p4 = scmp.eq.s32.totalorder %s29_s12, 0  ;;  %p40_p13 = scmp.eq.s32.totalorder %s1351_s27, 0 }
  0x57   : > { %p1077_p6 = scmp.lt.s32.totalorder %s1351_s27, 2  ;;  %p1705_p3 = scmp.eq.s32.totalorder %s1423_s28, 1 }
  0x58   : > { %s1552_s18 = scalar_select %p30_p4, %s1347_s26, %s32_s17  }
  0x59   : > { %p41_p10 = por %p40_p13, %p39_p8  ;;  %p1556_p5 = por %p1705_p3, %p39_p8 }
  0x5a   : > { %s269_s20 = sand.u32 1, %s1347_s26   ;;  %s948_s21 = sshll.u32 %s1351_s27, 8 }
  0x5b   : > { %s905_s16 = sshll.u32 %s269_s20, 4  ;;  %s1565_s10 = scalar_lea.hbm %s1687_s0, %s948_s21 }
  0x5c   : > { %s273_s11 = scalar_lea.vmem [#allocation2], %s905_s16  ;;  %p1567_p11 = pnand %p1077_p6, %p41_p10 }
  0x5d   : > { %s280_s14 = sshll.u32 %s273_s11, 4  ;;  %s1573_s12 = scalar_lea.sflag [#allocation3], %s269_s20  ;;  %s1571_s14 = int_to_ptr.vmem [resolvable:$true] %s280_s14 }
  0x5e   : > { %s1247_s17 = scalar_lea.hbm %s1565_s10, 256  ;;  %p1249_p9 = pneg %p1567_p11 }
  0x5f   : > { %p1248_p7 = scmp.ne.s32.totalorder %s1565_s10, %s1247_s17  ;;  %s1252_s23 = scalar_lea.hbm %s1687_s0, 512 }
  0x60   : > { %p1253_p1 = scmp.lt.u32.totalorder %s1565_s10, %s1687_s0  ;;  %p1254_p2 = scmp.lt.u32.totalorder %s1252_s23, %s1247_s17 }
  0x61   : > { %p1250_p12 = pnand %p1249_p9, %p1248_p7  ;;  %p1256_p8 = scmp.lt.u32.totalorder %s1247_s17, %s1565_s10 }
  0x62   : > { %p1255_p4 = por %p1254_p2, %p1253_p1 }
  0x63   : > { %p1251_p0 = pneg %p1250_p12 }
  0x64   : > { %p1257_p13 = por %p1256_p8, %p1255_p4 }
  0x66   : > { %p1258_p6 = pnand %p1257_p13, %p1251_p0 }
  0x68   : > { %1261 = shalt.err (!%p1258_p6)
}
  0x69   : > { %s1262_s20 = scalar_lea.vmem %s1571_s14, 256  ;;  %s1358_s21 = smov [#allocation2]  }
  0x6a   : > { %p1263_p10 = scmp.ne.s32.totalorder %s1571_s14, %s1262_s20  ;;  %s1267_s16 = sshll.u32 %s1358_s21, 4  ;;  %s1268_s16 = int_to_ptr.vmem [resolvable:$false] %s1267_s16 }
  0x6b   : > { %s1269_s29 = scalar_lea.vmem %s1268_s16, 512  ;;  %p1270_p12 = scmp.lt.s32.totalorder %s1571_s14, %s1268_s16 }
  0x6c   : > { %p1265_p3 = pnand %p1263_p10, %p1249_p9  ;;  %p1271_p1 = scmp.lt.s32.totalorder %s1269_s29, %s1262_s20 }
  0x6e   : > { %p1266_p7 = pneg %p1265_p3  ;;  %p1272_p2 = por %p1271_p1, %p1270_p12 }
  0x70   : > { %p1273_p4 = pnand %p1272_p2, %p1266_p7 }
  0x72   : > { %1276 = shalt.err (!%p1273_p4)
}
  0x73   : > { %1069 = dma.hbm_to_vmem [thread:$0]  (!%p1567_p11), %s1565_s10, 256, %s1571_s14, %s1573_s12, %s1356_s13, %s1356_s13, %s1357_s15  }
  0x74   : > { %p1708_p9 = scmp.ne.s32.totalorder %s1702_s9, 0 }
  0x75   : > { %s1607_s17 = sand.u32 (!%p1708_p9), 1, %s1343_s25   ;;  %p1709_p0 = scmp.ne.s32.totalorder (!%p1708_p9), %s1699_s30, 0 }
  0x76   : > { %292 = sbr.rel (%p1708_p9) target bundleno = 1163 (0x48b), region = 48  ;;  %s909_s23 = sshll.u32 (!%p1708_p9), %s1607_s17, 4 }
  0x77   : > { %s295_s11 = scalar_lea.sflag (!%p1708_p9), [#allocation3], %s1607_s17  ;;  %s1611_s20 = scalar_lea.vmem (!%p1708_p9), [#allocation2], %s909_s23 }
  0x7d   : > { %1322 = dma.done.wait (%p1709_p0), %s295_s11, 256  }
  0x7e   : > { %1324 = vsyncadd (%p1709_p0), %s295_s11, 4294967040  ;;  %p1710_p11 = scmp.eq.s32.totalorder %s1423_s28, 0 }
  0x80   : > { %1326 = dma.done.wait (%p1710_p11), [#allocation6], 2048   ;;  %p1711_p8 = pmov %p1710_p11 }
  0x82   : > { %1328 = vsyncadd (%p1711_p8), [#allocation6], 4294965248  ;;  %p1712_p13 = pmov %p1711_p8 }
  0x83   : > { %p1713_p6 = pmov %p1711_p8 }
  0x84   : > { %1330 = dma.done.wait (%p1712_p13), [#allocation9], 1024  }
  0x85   : > { %1332 = vsyncadd (%p1713_p6), [#allocation9], 4294966272  ;;  %v1121_v0 = vld [vmem:[#allocation5] sm:$0xff]   ;;  %v1122_v1 = vld [vmem:[#allocation5 + $0x8] sm:$0xff]   ;;  %v732_v56 = vlaneseq  ;;  %s913_s8 = sshll.u32 %s1607_s17, 5  ;;  %s949_s16 = sshll.u32 %s1423_s28, 9 }
  0x86   : > { %980 = vmatprep.subr.bf16.mxu0 %v1121_v0  ;;  %v1123_v2 = vld [vmem:[#allocation5 + $0x10] sm:$0xff]   ;;  %v1124_v3 = vld [vmem:[#allocation5 + $0x18] sm:$0xff]   ;;  %v1131_v5 = vld [vmem:[#allocation7] sm:$0xff]   ;;  %s340_s12 = scalar_lea.vmem [#allocation10], %s913_s8  ;;  %s1643_s11 = scalar_lea.hbm %s1694_s7, %s949_s16 }
  0x87   : > { %981 = vmatpush3.bf16.msra.mxu0 %v1121_v0  ;;  %v1129_v4 = vld [vmem:[%s1611_s20] sm:$0xff]   ;;  %v1132_v6 = vld [vmem:[#allocation7 + $0x8] sm:$0xff]   ;;  %1000 = vmatprep.subr.bf16.mxu1 %v1131_v5  ;;  %v1134_v10 = vld [vmem:[#allocation7 + $0x18] sm:$0xff]   ;;  %v733_v57 = vand.u32 127, %v732_v56  ;;  %s797_s21 = sshll.u32 %s340_s12, 4  ;;  %s1359_s28 = smov [#allocation10]   ;;  %s1638_s21 = int_to_ptr.vmem [resolvable:$true] %s797_s21 }
  0x88   : > { %982 = vmatprep.subr.bf16.mxu0 %v1122_v1  ;;  %996 = vmatprep.mubr.bf16.mxu0 %v1129_v4  ;;  %v1125_v7 = vld [vmem:[#allocation5 + $0x20] sm:$0xff]   ;;  %v1133_v8 = vld [vmem:[#allocation7 + $0x10] sm:$0xff]   ;;  %v1126_v9 = vld [vmem:[#allocation5 + $0x28] sm:$0xff]   ;;  %s1277_s30 = scalar_lea.vmem %s1638_s21, 512  ;;  %s1281_s9 = sshll.u32 %s1359_s28, 4  ;;  %s1282_s9 = int_to_ptr.vmem [resolvable:$false] %s1281_s9 }
  0x89   : > { %1001 = vmatpush3.bf16.msra.mxu1 %v1131_v5  ;;  %v1127_v11 = vld [vmem:[#allocation5 + $0x30] sm:$0xff]   ;;  %v1135_v12 = vld [vmem:[#allocation7 + $0x20] sm:$0xff]   ;;  %v1128_v13 = vld [vmem:[#allocation5 + $0x38] sm:$0xff]   ;;  %vm734_vm0 = vcmp.lt.s32.totalorder %v733_v57, 10  ;;  %p1278_p10 = scmp.ne.s32.totalorder %s1638_s21, %s1277_s30  ;;  %s1283_s13 = scalar_lea.vmem %s1282_s9, 1024 }
  0x8a   : > { %1002 = vmatprep.subr.bf16.mxu1 %v1132_v6  ;;  %v1136_v14 = vld [vmem:[#allocation7 + $0x28] sm:$0xff]   ;;  %v1137_v16 = vld [vmem:[#allocation7 + $0x30] sm:$0xff]   ;;  %v1138_v17 = vld [vmem:[#allocation7 + $0x38] sm:$0xff]   ;;  %p1284_p12 = scmp.lt.s32.totalorder %s1638_s21, %s1282_s9  ;;  %p1285_p1 = scmp.lt.s32.totalorder %s1283_s13, %s1277_s30 }
  0x8b   : > { %983 = vmatpush3.bf16.msra.mxu0 %v1122_v1  ;;  %v1130_v15 = vld [vmem:[%s1611_s20 + $0x8] sm:$0xff]   ;;  %v1139_v18 = vld [vmem:[#allocation8] sm:$0xff]   ;;  %v1141_v20 = vld [vmem:[#allocation8 + $0x10] sm:$0xff]   ;;  %s784_s20 = scalar_lea.sflag [#allocation4], %s1607_s17  ;;  %p1279_p3 = pnand %p1278_p10, %p1556_p5 }
  0x8c   : > { %984 = vmatprep.subr.bf16.mxu0 %v1123_v2  ;;  %v1140_v19 = vld [vmem:[#allocation8 + $0x8] sm:$0xff]   ;;  %v1142_v21 = vld [vmem:[#allocation8 + $0x18] sm:$0xff]   ;;  %v1143_v22 = vld [vmem:[#allocation8 + $0x20] sm:$0xff]   ;;  %p1286_p2 = por %p1285_p1, %p1284_p12 }
  0x8d   : > { %1003 = vmatpush3.bf16.msra.mxu1 %v1132_v6  ;;  %v1144_v23 = vld [vmem:[#allocation8 + $0x28] sm:$0xff]   ;;  %v914_v24 = vld [vmem:[%s1689_s2] ss:$0 sm:$0xff]  ;;  %v1145_v39 = vld [vmem:[#allocation8 + $0x30] sm:$0xff]   ;;  %p1280_p7 = pneg %p1279_p3 }
  0x8e   : > { %1004 = vmatprep.subr.bf16.mxu1 %v1133_v8  ;;  %v1146_v40 = vld [vmem:[#allocation8 + $0x38] sm:$0xff]   ;;  %v925_v41 = vld [vmem:[%s1691_s4] ss:$0 sm:$0xff] }
  0x8f   : > { %985 = vmatpush3.bf16.msra.mxu0 %v1123_v2  ;;  %v934_v58 = vld [vmem:[%s1693_s6] ss:$0 sm:$0xff]  ;;  %p1287_p4 = pnand %p1286_p2, %p1280_p7 }
  0x90   : > { %986 = vmatprep.subr.bf16.mxu0 %v1124_v3 }
  0x91   : > { %1005 = vmatpush3.bf16.msra.mxu1 %v1133_v8 }
  0x92   : > { %1006 = vmatprep.subr.bf16.mxu1 %v1134_v10 }
  0x93   : > { %987 = vmatpush3.bf16.msra.mxu0 %v1124_v3 }
  0x94   : > { %988 = vmatprep.subr.bf16.mxu0 %v1125_v7 }
  0x95   : > { %1007 = vmatpush3.bf16.msra.mxu1 %v1134_v10 }
  0x96   : > { %1008 = vmatprep.subr.bf16.mxu1 %v1135_v12 }
  0x97   : > { %989 = vmatpush3.bf16.msra.mxu0 %v1125_v7 }
  0x98   : > { %990 = vmatprep.subr.bf16.mxu0 %v1126_v9 }
  0x99   : > { %1009 = vmatpush3.bf16.msra.mxu1 %v1135_v12 }
  0x9a   : > { %1010 = vmatprep.subr.bf16.mxu1 %v1136_v14 }
  0x9b   : > { %991 = vmatpush3.bf16.msra.mxu0 %v1126_v9 }
  0x9c   : > { %992 = vmatprep.subr.bf16.mxu0 %v1127_v11 }
  0x9d   : > { %1011 = vmatpush3.bf16.msra.mxu1 %v1136_v14 }
  0x9e   : > { %1012 = vmatprep.subr.bf16.mxu1 %v1137_v16 }
  0x9f   : > { %993 = vmatpush3.bf16.msra.mxu0 %v1127_v11 }
  0xa0   : > { %994 = vmatprep.subr.bf16.mxu0 %v1128_v13 }
  0xa1   : > { %1013 = vmatpush3.bf16.msra.mxu1 %v1137_v16 }
  0xa2   : > { %1014 = vmatprep.subr.bf16.mxu1 %v1138_v17 }
  0xa3   : > { %995 = vmatpush3.bf16.msra.mxu0 %v1128_v13 }
  0xa4   : > { %1020 = vmatprep.subr.bf16.mxu0 %v1139_v18 }
  0xa5   : > { %1015 = vmatpush3.bf16.msra.mxu1 %v1138_v17 }
  0xa6   : > { %997 = vmatmul.mubr.bf16.vlgmr.msra.gmra.mrb[0].mxu0 %v1130_v15 }
  0xa7   : > { %1021 = vmatpush3.bf16.msra.mxu0 %v1139_v18 }
  0xa8   : > { %1022 = vmatprep.subr.bf16.mxu0 %v1140_v19 }
  0xab   : > { %1023 = vmatpush3.bf16.msra.mxu0 %v1140_v19 }
  0xac   : > { %1024 = vmatprep.subr.bf16.mxu0 %v1141_v20 }
  0xaf   : > { %1025 = vmatpush3.bf16.msra.mxu0 %v1141_v20 }
  0xb0   : > { %1026 = vmatprep.subr.bf16.mxu0 %v1142_v21 }
  0xb3   : > { %1027 = vmatpush3.bf16.msra.mxu0 %v1142_v21 }
  0xb4   : > { %1028 = vmatprep.subr.bf16.mxu0 %v1143_v22 }
  0xb7   : > { %1029 = vmatpush3.bf16.msra.mxu0 %v1143_v22 }
  0xb8   : > { %1030 = vmatprep.subr.bf16.mxu0 %v1144_v23 }
  0xbb   : > { %1031 = vmatpush3.bf16.msra.mxu0 %v1144_v23 }
  0xbc   : > { %1032 = vmatprep.subr.bf16.mxu0 %v1145_v39 }
  0xbf   : > { %1033 = vmatpush3.bf16.msra.mxu0 %v1145_v39 }
  0xc0   : > { %1034 = vmatprep.subr.bf16.mxu0 %v1146_v40 }
  0xc3   : > { %1035 = vmatpush3.bf16.msra.mxu0 %v1146_v40 }
 0x179   : > { %v998_v25 = vpop.f32.mrb[0].mxu0 }
 0x17a   : > { %v474_v26 = vadd.f32 %v998_v25, %v914_v24  ;;  %v465_v27 = vpop.f32.mrb[1].mxu0 }
 0x17b   : > { %v466_v28 = vadd.f32 %v914_v24, %v465_v27  ;;  %v999_v29 = vpop.f32.mrb[2].mxu0 }
 0x17c   : > { %v477_v30 = vadd.f32 %v999_v29, %v914_v24  ;;  %v468_v31 = vpop.f32.mrb[3].mxu0  ;;  %v482_v33 = vmax.f32 %v474_v26, 0.0 }
 0x17d   : > { %v469_v32 = vadd.f32 %v914_v24, %v468_v31  ;;  %v480_v35 = vmax.f32 %v466_v28, 0.0 }
 0x17e   : > { %v483_v34 = vmax.f32 %v477_v30, 0.0 }
 0x17f   : > { %v481_v36 = vmax.f32 %v469_v32, 0.0 }
 0x180   : > { %v485_v37 = vpack.c.bf16 %v483_v34, %v482_v33 }
 0x181   : > { %v484_v38 = vpack.c.bf16 %v481_v36, %v480_v35 }
 0x183   : > { %1016 = vmatprep.mubr.bf16.mxu1 %v484_v38 }
 0x184   : > { %1017 = vmatmul.mubr.bf16.vlgmr.msra.gmra.mrb[0].mxu1 %v485_v37 }
 0x257   : > { %v1018_v42 = vpop.f32.mrb[0].mxu1 }
 0x258   : > { %v600_v43 = vadd.f32 %v1018_v42, %v925_v41  ;;  %v591_v44 = vpop.f32.mrb[1].mxu1 }
 0x259   : > { %v592_v45 = vadd.f32 %v925_v41, %v591_v44  ;;  %v1019_v46 = vpop.f32.mrb[2].mxu1 }
 0x25a   : > { %v603_v47 = vadd.f32 %v1019_v46, %v925_v41  ;;  %v594_v48 = vpop.f32.mrb[3].mxu1  ;;  %v608_v50 = vmax.f32 %v600_v43, 0.0 }
 0x25b   : > { %v595_v49 = vadd.f32 %v925_v41, %v594_v48  ;;  %v606_v52 = vmax.f32 %v592_v45, 0.0 }
 0x25c   : > { %v609_v51 = vmax.f32 %v603_v47, 0.0 }
 0x25d   : > { %v607_v53 = vmax.f32 %v595_v49, 0.0 }
 0x25e   : > { %v611_v54 = vpack.c.bf16 %v609_v51, %v608_v50 }
 0x25f   : > { %v610_v55 = vpack.c.bf16 %v607_v53, %v606_v52 }
 0x261   : > { %1036 = vmatprep.mubr.bf16.mxu0 %v610_v55 }
 0x262   : > { %1037 = vmatmul.mubr.bf16.vlgmr.msra.gmra.mrb[4].mxu0 %v611_v54 }
 0x335   : > { %v1038_v59 = vpop.f32.mrb[4].mxu0 }
 0x336   : > { %v726_v60 = vadd.f32 %v1038_v59, %v934_v58  ;;  %v717_v61 = vpop.f32.mrb[5].mxu0 }
 0x337   : > { %v718_v62 = vadd.f32 %v934_v58, %v717_v61  ;;  %v1039_v63 = vpop.f32.mrb[6].mxu0 }
 0x338   : > { %v729_v0 = vadd.f32 %v1039_v63, %v934_v58  ;;  %v720_v1 = vpop.f32.mrb[7].mxu0  ;;  %v737_v2 = vsel %vm734_vm0, %v726_v60, -1e+30 }
 0x339   : > { %v721_v3 = vadd.f32 %v934_v58, %v720_v1  ;;  %743 = vmax.xlane.f32.xlu1 %v737_v2  ;;  %v735_v4 = vsel %vm734_vm0, %v718_v62, -1e+30 }
 0x33a   : > { %739 = vmax.xlane.f32.xlu0 %v735_v4  ;;  %v738_v5 = vsel %vm734_vm0, %v729_v0, -1e+30 }
 0x33b   : > { %v736_v6 = vsel %vm734_vm0, %v721_v3, -1e+30 }
 0x33d   : > { %745 = vmax.xlane.f32.xlu1 %v738_v5 }
 0x33e   : > { %741 = vmax.xlane.f32.xlu0 %v736_v6 }
 0x3c6   : > { %v744_v7 = vpop.xlane.xlu1 %743 }
 0x3c7   : > { %v749_v8 = vsub.f32 %v737_v2, %v744_v7  ;;  %v740_v9 = vpop.xlane.xlu0 %739 }
 0x3c8   : > { %v747_v10 = vsub.f32 %v735_v4, %v740_v9 }
 0x3c9   : > { %v755_v13 = vmul.f32 1.442695, %v749_v8 }
 0x3ca   : > { %v751_v11 = vmul.f32 1.442695, %v747_v10  ;;  %v746_v12 = vpop.xlane.xlu1 %745 }
 0x3cb   : > { %v742_v14 = vpop.xlane.xlu0 %741  ;;  %v750_v15 = vsub.f32 %v738_v5, %v746_v12 }
 0x3cc   : > { %1147 = vpow2.f32 %v751_v11  ;;  %v748_v16 = vsub.f32 %v736_v6, %v742_v14 }
 0x3cd   : > { %1149 = vpow2.f32 %v755_v13  ;;  %v757_v18 = vmul.f32 1.442695, %v750_v15 }
 0x3ce   : > { %v753_v17 = vmul.f32 1.442695, %v748_v16 }
 0x3d0   : > { %1151 = vpow2.f32 %v753_v17 }
 0x3d1   : > { %1153 = vpow2.f32 %v757_v18 }
 0x3d6   : > { %v1148_v19 = vpop.eup %1147 }
 0x3d7   : > { %759 = vadd.xlane.f32.xlu0 %v1148_v19  ;;  %v1150_v20 = vpop.eup %1149 }
 0x3da   : > { %v1152_v21 = vpop.eup %1151 }
 0x3db   : > { %763 = vadd.xlane.f32.xlu0 %v1150_v20  ;;  %761 = vadd.xlane.f32.xlu1 %v1152_v21  ;;  %v1154_v22 = vpop.eup %1153 }
 0x3df   : > { %765 = vadd.xlane.f32.xlu1 %v1154_v22 }
 0x464   : > { %v760_v23 = vpop.xlane.xlu0 %759 }
 0x465   : > { %1155 = vlog2.f32 %v760_v23 }
 0x468   : > { %v762_v24 = vpop.xlane.xlu1 %761  ;;  %v764_v25 = vpop.xlane.xlu0 %763 }
 0x469   : > { %1157 = vlog2.f32 %v762_v24 }
 0x46a   : > { %1159 = vlog2.f32 %v764_v25 }
 0x46c   : > { %v766_v26 = vpop.xlane.xlu1 %765 }
 0x46d   : > { %1161 = vlog2.f32 %v766_v26 }
 0x46f   : > { %v1156_v27 = vpop.eup %1155 }
 0x470   : > { %v768_v28 = vmul.f32 0.6931472, %v1156_v27 }
 0x472   : > { %v775_v29 = vsub.f32 %v747_v10, %v768_v28 }
 0x473   : > { %v1158_v30 = vpop.eup %1157 }
 0x474   : > { %v1160_v31 = vpop.eup %1159  ;;  %779 = vst [vmem:[%s340_s12] sm:$0xff] %v775_v29  ;;  %v770_v32 = vmul.f32 0.6931472, %v1158_v30 }
 0x475   : > { %v772_v33 = vmul.f32 0.6931472, %v1160_v31 }
 0x476   : > { %v776_v34 = vsub.f32 %v748_v16, %v770_v32 }
 0x477   : > { %v1162_v35 = vpop.eup %1161  ;;  %v777_v36 = vsub.f32 %v749_v8, %v772_v33 }
 0x478   : > { %780 = vst [vmem:[%s340_s12 + $0x8] sm:$0xff] %v776_v34  ;;  %v774_v37 = vmul.f32 0.6931472, %v1162_v35 }
 0x479   : > { %781 = vst [vmem:[%s340_s12 + $0x10] sm:$0xff] %v777_v36 }
 0x47a   : > { %v778_v38 = vsub.f32 %v750_v15, %v774_v37 }
 0x47c   : > { %782 = vst [vmem:[%s340_s12 + $0x18] sm:$0xff] %v778_v38 }
 0x47d   : > { %1290 = shalt.err (!%p1287_p4)
}
 0x47e   : > { %s1291_s15 = scalar_lea.hbm %s1643_s11, 512  ;;  %s1295_s8 = scalar_lea.hbm %s1694_s7, 1024 }
 0x47f   : > { %p1292_p9 = scmp.ne.s32.totalorder %s1643_s11, %s1291_s15  ;;  %p1296_p8 = scmp.lt.u32.totalorder %s1643_s11, %s1694_s7 }
 0x480   : > { %p1297_p13 = scmp.lt.u32.totalorder %s1295_s8, %s1291_s15  ;;  %p1299_p10 = scmp.lt.u32.totalorder %s1291_s15, %s1643_s11 }
 0x481   : > { %p1293_p0 = pnand %p1292_p9, %p1556_p5 }
 0x482   : > { %p1298_p6 = por %p1297_p13, %p1296_p8 }
 0x483   : > { %p1294_p11 = pneg %p1293_p0 }
 0x484   : > { %p1300_p3 = por %p1299_p10, %p1298_p6 }
 0x486   : > { %p1301_p7 = pnand %p1300_p3, %p1294_p11 }
 0x488   : > { %1304 = shalt.err (!%p1301_p7)
}
 0x489   : > { %s1360_s29 = smov 128   ;;  %s1361_s23 = smov 8  }
 0x48a   : > { %1054 = dma.vmem_to_hbm [thread:$0]  (%p1556_p5), %s1638_s21, 512, %s1643_s11, %s784_s20, %s1360_s29, %s1360_s29, %s1361_s23  }
 0x48b PF: > { %s1714_s30 = sld [smem:[#allocation15_spill]]  ;;  %s812_s28 = sand.u32 1, %s1339_s24  }
 0x48c   : > { %p1716_p1 = scmp.ge.s32.totalorder %s1351_s27, 2  ;;  %s813_s9 = scalar_lea.sflag [#allocation4], %s812_s28 }
 0x491   : > { %p1715_p12 = scmp.ne.s32.totalorder %s1714_s30, 0 }
 0x493   : > { %p1071_p2 = pnand %p1716_p1, %p1715_p12 }
 0x495   : > { %1334 = dma.done.wait (!%p1071_p2), %s813_s9, 512  }
 0x496   : > { %1336 = vsyncadd (!%p1071_p2), %s813_s9, 4294966784  ;;  %p22_p4 = scmp.ge.s32.totalorder %s1542_s22, 4   ;;  %s1717_s24 = smov %s1343_s25 }
 0x497   : > { %s1718_s25 = smov %s1347_s26  ;;  %s1719_s26 = smov %s1552_s18 }
 0x498   : > { %s1720_s27 = smov %s1542_s22  ;;  %24 = sbr.rel (!%p22_p4) target bundleno = 7 (0x7), region = 105 }
 0x49f   :  { %818 = vsyncpa [#allocation3], 1 }
 0x4a0   :  { %820 = vsyncpa [#allocation3 + $0x1], 1 }
 0x4a1   :  { %821 = vsyncpa [#allocation6], 1 }
 0x4a2   :  { %822 = vsyncpa [#allocation9], 1 }
 0x4a3   :  { %823 = vsyncpa [#allocation4], 1 }
 0x4a4   :  { %825 = vsyncpa [#allocation4 + $0x1], 1 }

// kernel: tpu_custom_call.1
= control target key start
LH: loop header
LB: loop body
LE: loop exit
PB: predicated region body
PF: predicated region fallthrough
CT: control target
= control target key end

     0   :  { %12 = vsyncpa [#allocation3], 0  ;;  %s1687_s0 = inlined_call_operand.hbm [shape: bf16[64,128], index: 0, kind: input, shape index: {}]   ;;  %s1688_s1 = inlined_call_operand.hbm [shape: bf16[128,128], index: 1, kind: input, shape index: {}]   ;;  %s1689_s2 = inlined_call_operand.vmem [shape: f32[1,128], index: 2, kind: input, shape index: {}]   ;;  %s1690_s3 = inlined_call_operand.hbm [shape: bf16[128,128], index: 3, kind: input, shape index: {}]   ;;  %s1691_s4 = inlined_call_operand.vmem [shape: f32[1,128], index: 4, kind: input, shape index: {}]   ;;  %s1692_s5 = inlined_call_operand.hbm [shape: bf16[128,128], index: 5, kind: input, shape index: {}]   ;;  %s1693_s6 = inlined_call_operand.vmem [shape: f32[1,128], index: 6, kind: input, shape index: {}]   ;;  %s1694_s7 = inlined_call_operand.hbm [shape: f32[64,128], index: 7, kind: output, shape index: {}]  }
   0x1   :  { %14 = vsyncpa [#allocation3 + $0x1], 0 }
   0x2   :  { %15 = vsyncpa [#allocation6], 0 }
   0x3   :  { %16 = vsyncpa [#allocation9], 0 }
   0x4   :  { %17 = vsyncpa [#allocation4], 0 }
   0x5   :  { %19 = vsyncpa [#allocation4 + $0x1], 0  ;;  %s1402_s24 = smov 0   ;;  %s1404_s25 = smov 0  }
   0x6   :  { %s1406_s26 = smov 0   ;;  %s1408_s27 = smov 0  }
   0x7 LB: > { %s1423_s28 = sadd.s32 4294967295, %s1351_s27   ;;  %s899_s29 = sadd.s32 4294967294, %s1351_s27   ;;  %s1351_s27 = sphi %s1408_s27, %s1720_s27   ;;  %s1347_s26 = sphi %s1406_s26, %s1719_s26   ;;  %s1343_s25 = sphi %s1404_s25, %s1718_s25   ;;  %s1339_s24 = sphi %s1402_s24, %s1717_s24  }
   0x8   : > { %p45_p0 = scmp.ne.s32.totalorder %s1343_s25, %s1339_s24  ;;  %p1695_p1 = scmp.eq.s32.totalorder %s1423_s28, 0 }
   0x9   : > { %p201_p3 = scmp.eq.s32.totalorder %s899_s29, 1  ;;  %p900_p5 = scmp.ge.s32.totalorder %s1351_s27, 1 }
   0xa   : > { %p1432_p4 = por %p1695_p1, %p45_p0  ;;  %p208_p7 = scmp.lt.s32.totalorder %s1351_s27, 3 }
   0xb   : > { %p1437_p6 = por %p201_p3, %p45_p0  ;;  %s1353_s10 = smov [#allocation5]  }
   0xc   : > { %s1699_s30 = scalar_select %p1432_p4, 1, 0 }
   0xd   : > { %s1700_s8 = scalar_select %p1437_p6, 1, 0 }
   0xe   : > { %p1442_p8 = pnand %p900_p5, %p208_p7  ;;  %s220_s11 = sshll.u32 %s1353_s10, 4  ;;  %s1446_s11 = int_to_ptr.vmem [resolvable:$true] %s220_s11 }
   0xf   : > { %1701 = sst [smem:[#allocation15_spill]] %s1700_s8  ;;  %s1354_s13 = smov [#allocation7]  }
  0x10   : > { %s1702_s9 = scalar_select %p1442_p8, 1, 0 }
  0x11   : > { %p1056_p9 = pneg %p1442_p8  ;;  %s236_s14 = sshll.u32 %s1354_s13, 4  ;;  %s1457_s14 = int_to_ptr.vmem [resolvable:$true] %s236_s14 }
  0x12   : > { %s1355_s15 = smov [#allocation8]   ;;  %s1163_s19 = scalar_lea.hbm %s1688_s1, 1024 }
  0x13   : > { %p1453_p11 = pnand %p1056_p9, %p1695_p1  ;;  %s1459_s16 = sshll.u32 %s1355_s15, 4  ;;  %s253_s16 = int_to_ptr.vmem [resolvable:$true] %s1459_s16 }
  0x14   : > { %p1164_p12 = scmp.ne.s32.totalorder %s1688_s1, %s1163_s19  ;;  %p1170_p5 = scmp.lt.u32.totalorder %s1163_s19, %s1688_s1 }
  0x15   : > { %p1469_p13 = pneg %p1453_p11 }
  0x17   : > { %p1166_p0 = pnand %p1469_p13, %p1164_p12 }
  0x19   : > { %p1167_p3 = pneg %p1166_p0 }
  0x1b   : > { %p1172_p7 = pnand %p1170_p5, %p1167_p3 }
  0x1d   : > { %1175 = shalt.err (!%p1172_p7)
}
  0x1e   : > { %s1176_s10 = scalar_lea.vmem %s1446_s11, 1024  ;;  %p1184_p2 = scmp.lt.s32.totalorder %s1446_s11, %s1446_s11 }
  0x1f   : > { %p1177_p9 = scmp.ne.s32.totalorder %s1446_s11, %s1176_s10  ;;  %p1185_p6 = scmp.lt.s32.totalorder %s1176_s10, %s1176_s10 }
  0x21   : > { %p1179_p10 = pnand %p1177_p9, %p1469_p13  ;;  %p1186_p12 = por %p1185_p6, %p1184_p2 }
  0x23   : > { %p1180_p1 = pneg %p1179_p10 }
  0x25   : > { %p1187_p0 = pnand %p1186_p12, %p1180_p1 }
  0x27   : > { %1190 = shalt.err (!%p1187_p0)
}
  0x28   : > { %s1356_s13 = smov 64   ;;  %s1357_s15 = smov 4  }
  0x29   : > { %1059 = dma.hbm_to_vmem [thread:$0]  (!%p1453_p11), %s1688_s1, 1024, %s1446_s11, [#allocation6], %s1356_s13, %s1356_s13, %s1357_s15  }
  0x2a   : > { %s1191_s21 = scalar_lea.hbm %s1690_s3, 1024 }
  0x2b   : > { %p1192_p1 = scmp.ne.s32.totalorder %s1690_s3, %s1191_s21  ;;  %p1198_p10 = scmp.lt.u32.totalorder %s1191_s21, %s1690_s3 }
  0x2d   : > { %p1194_p2 = pnand %p1192_p1, %p1469_p13 }
  0x2f   : > { %p1195_p6 = pneg %p1194_p2 }
  0x31   : > { %p1200_p3 = pnand %p1198_p10, %p1195_p6 }
  0x33   : > { %1203 = shalt.err (!%p1200_p3)
}
  0x34   : > { %s1204_s11 = scalar_lea.vmem %s1457_s14, 1024  ;;  %p1212_p12 = scmp.lt.s32.totalorder %s1457_s14, %s1457_s14 }
  0x35   : > { %p1205_p5 = scmp.ne.s32.totalorder %s1457_s14, %s1204_s11  ;;  %p1213_p0 = scmp.lt.s32.totalorder %s1204_s11, %s1204_s11 }
  0x37   : > { %p1207_p7 = pnand %p1205_p5, %p1469_p13  ;;  %p1214_p1 = por %p1213_p0, %p1212_p12 }
  0x39   : > { %p1208_p9 = pneg %p1207_p7 }
  0x3b   : > { %p1215_p2 = pnand %p1214_p1, %p1208_p9 }
  0x3d   : > { %1218 = shalt.err (!%p1215_p2)
}
  0x3e   : > { %1062 = dma.hbm_to_vmem [thread:$0]  (!%p1453_p11), %s1690_s3, 1024, %s1457_s14, [#allocation6], %s1356_s13, %s1356_s13, %s1357_s15  }
  0x3f   : > { %s1219_s20 = scalar_lea.hbm %s1692_s5, 1024 }
  0x40   : > { %p1220_p6 = scmp.ne.s32.totalorder %s1692_s5, %s1219_s20  ;;  %p1226_p5 = scmp.lt.u32.totalorder %s1219_s20, %s1692_s5 }
  0x42   : > { %p1222_p10 = pnand %p1220_p6, %p1469_p13 }
  0x44   : > { %p1223_p3 = pneg %p1222_p10 }
  0x46   : > { %p1228_p7 = pnand %p1226_p5, %p1223_p3 }
  0x48   : > { %1231 = shalt.err (!%p1228_p7)
}
  0x49   : > { %s1232_s11 = scalar_lea.vmem %s253_s16, 1024  ;;  %p1240_p1 = scmp.lt.s32.totalorder %s253_s16, %s253_s16 }
  0x4a   : > { %p1233_p9 = scmp.ne.s32.totalorder %s253_s16, %s1232_s11  ;;  %p1241_p2 = scmp.lt.s32.totalorder %s1232_s11, %s1232_s11 }
  0x4c   : > { %p1235_p12 = pnand %p1233_p9, %p1469_p13  ;;  %p1242_p4 = por %p1241_p2, %p1240_p1 }
  0x4e   : > { %p1236_p0 = pneg %p1235_p12 }
  0x50   : > { %p1243_p8 = pnand %p1242_p4, %p1236_p0 }
  0x52   : > { %1246 = shalt.err (!%p1243_p8)
}
  0x53   : > { %1065 = dma.hbm_to_vmem [thread:$0]  (!%p1453_p11), %s1692_s5, 1024, %s253_s16, [#allocation9], %s1356_s13, %s1356_s13, %s1357_s15  }
  0x54   : > { %s1542_s22 = sadd.s32 1, %s1351_s27   ;;  %s32_s17 = sadd.s32 1, %s1347_s26 }
  0x55   : > { %s29_s12 = ssub.s32 %s1351_s27, %s1542_s22  ;;  %p39_p8 = scmp.ne.s32.totalorder %s1347_s26, %s1343_s25 }
  0x56   : > { %p30_p4 = scmp.eq.s32.totalorder %s29_s12, 0  ;;  %p40_p13 = scmp.eq.s32.totalorder %s1351_s27, 0 }
  0x57   : > { %p1077_p6 = scmp.lt.s32.totalorder %s1351_s27, 2  ;;  %p1705_p3 = scmp.eq.s32.totalorder %s1423_s28, 1 }
  0x58   : > { %s1552_s18 = scalar_select %p30_p4, %s1347_s26, %s32_s17  }
  0x59   : > { %p41_p10 = por %p40_p13, %p39_p8  ;;  %p1556_p5 = por %p1705_p3, %p39_p8 }
  0x5a   : > { %s269_s20 = sand.u32 1, %s1347_s26   ;;  %s948_s21 = sshll.u32 %s1351_s27, 8 }
  0x5b   : > { %s905_s16 = sshll.u32 %s269_s20, 4  ;;  %s1565_s10 = scalar_lea.hbm %s1687_s0, %s948_s21 }
  0x5c   : > { %s273_s11 = scalar_lea.vmem [#allocation2], %s905_s16  ;;  %p1567_p11 = pnand %p1077_p6, %p41_p10 }
  0x5d   : > { %s280_s14 = sshll.u32 %s273_s11, 4  ;;  %s1573_s12 = scalar_lea.sflag [#allocation3], %s269_s20  ;;  %s1571_s14 = int_to_ptr.vmem [resolvable:$true] %s280_s14 }
  0x5e   : > { %s1247_s17 = scalar_lea.hbm %s1565_s10, 256  ;;  %p1249_p9 = pneg %p1567_p11 }
  0x5f   : > { %p1248_p7 = scmp.ne.s32.totalorder %s1565_s10, %s1247_s17  ;;  %s1252_s23 = scalar_lea.hbm %s1687_s0, 512 }
  0x60   : > { %p1253_p1 = scmp.lt.u32.totalorder %s1565_s10, %s1687_s0  ;;  %p1254_p2 = scmp.lt.u32.totalorder %s1252_s23, %s1247_s17 }
  0x61   : > { %p1250_p12 = pnand %p1249_p9, %p1248_p7  ;;  %p1256_p8 = scmp.lt.u32.totalorder %s1247_s17, %s1565_s10 }
  0x62   : > { %p1255_p4 = por %p1254_p2, %p1253_p1 }
  0x63   : > { %p1251_p0 = pneg %p1250_p12 }
  0x64   : > { %p1257_p13 = por %p1256_p8, %p1255_p4 }
  0x66   : > { %p1258_p6 = pnand %p1257_p13, %p1251_p0 }
  0x68   : > { %1261 = shalt.err (!%p1258_p6)
}
  0x69   : > { %s1262_s20 = scalar_lea.vmem %s1571_s14, 256  ;;  %s1358_s21 = smov [#allocation2]  }
  0x6a   : > { %p1263_p10 = scmp.ne.s32.totalorder %s1571_s14, %s1262_s20  ;;  %s1267_s16 = sshll.u32 %s1358_s21, 4  ;;  %s1268_s16 = int_to_ptr.vmem [resolvable:$false] %s1267_s16 }
  0x6b   : > { %s1269_s29 = scalar_lea.vmem %s1268_s16, 512  ;;  %p1270_p12 = scmp.lt.s32.totalorder %s1571_s14, %s1268_s16 }
  0x6c   : > { %p1265_p3 = pnand %p1263_p10, %p1249_p9  ;;  %p1271_p1 = scmp.lt.s32.totalorder %s1269_s29, %s1262_s20 }
  0x6e   : > { %p1266_p7 = pneg %p1265_p3  ;;  %p1272_p2 = por %p1271_p1, %p1270_p12 }
  0x70   : > { %p1273_p4 = pnand %p1272_p2, %p1266_p7 }
  0x72   : > { %1276 = shalt.err (!%p1273_p4)
}
  0x73   : > { %1069 = dma.hbm_to_vmem [thread:$0]  (!%p1567_p11), %s1565_s10, 256, %s1571_s14, %s1573_s12, %s1356_s13, %s1356_s13, %s1357_s15  }
  0x74   : > { %p1708_p9 = scmp.ne.s32.totalorder %s1702_s9, 0 }
  0x75   : > { %s1607_s17 = sand.u32 (!%p1708_p9), 1, %s1343_s25   ;;  %p1709_p0 = scmp.ne.s32.totalorder (!%p1708_p9), %s1699_s30, 0 }
  0x76   : > { %292 = sbr.rel (%p1708_p9) target bundleno = 1163 (0x48b), region = 48  ;;  %s909_s23 = sshll.u32 (!%p1708_p9), %s1607_s17, 4 }
  0x77   : > { %s295_s11 = scalar_lea.sflag (!%p1708_p9), [#allocation3], %s1607_s17  ;;  %s1611_s20 = scalar_lea.vmem (!%p1708_p9), [#allocation2], %s909_s23 }
  0x7d   : > { %1322 = dma.done.wait (%p1709_p0), %s295_s11, 256  }
  0x7e   : > { %1324 = vsyncadd (%p1709_p0), %s295_s11, 4294967040  ;;  %p1710_p11 = scmp.eq.s32.totalorder %s1423_s28, 0 }
  0x80   : > { %1326 = dma.done.wait (%p1710_p11), [#allocation6], 2048   ;;  %p1711_p8 = pmov %p1710_p11 }
  0x82   : > { %1328 = vsyncadd (%p1711_p8), [#allocation6], 4294965248  ;;  %p1712_p13 = pmov %p1711_p8 }
  0x83   : > { %p1713_p6 = pmov %p1711_p8 }
  0x84   : > { %1330 = dma.done.wait (%p1712_p13), [#allocation9], 1024  }
  0x85   : > { %1332 = vsyncadd (%p1713_p6), [#allocation9], 4294966272  ;;  %v1121_v0 = vld [vmem:[#allocation5] sm:$0xff]   ;;  %v1122_v1 = vld [vmem:[#allocation5 + $0x8] sm:$0xff]   ;;  %v732_v56 = vlaneseq  ;;  %s913_s8 = sshll.u32 %s1607_s17, 5  ;;  %s949_s16 = sshll.u32 %s1423_s28, 9 }
  0x86   : > { %980 = vmatprep.subr.bf16.mxu0 %v1121_v0  ;;  %v1123_v2 = vld [vmem:[#allocation5 + $0x10] sm:$0xff]   ;;  %v1124_v3 = vld [vmem:[#allocation5 + $0x18] sm:$0xff]   ;;  %v1131_v5 = vld [vmem:[#allocation7] sm:$0xff]   ;;  %s340_s12 = scalar_lea.vmem [#allocation10], %s913_s8  ;;  %s1643_s11 = scalar_lea.hbm %s1694_s7, %s949_s16 }
  0x87   : > { %981 = vmatpush3.bf16.msra.mxu0 %v1121_v0  ;;  %v1129_v4 = vld [vmem:[%s1611_s20] sm:$0xff]   ;;  %v1132_v6 = vld [vmem:[#allocation7 + $0x8] sm:$0xff]   ;;  %1000 = vmatprep.subr.bf16.mxu1 %v1131_v5  ;;  %v1134_v10 = vld [vmem:[#allocation7 + $0x18] sm:$0xff]   ;;  %v733_v57 = vand.u32 127, %v732_v56  ;;  %s797_s21 = sshll.u32 %s340_s12, 4  ;;  %s1359_s28 = smov [#allocation10]   ;;  %s1638_s21 = int_to_ptr.vmem [resolvable:$true] %s797_s21 }
  0x88   : > { %982 = vmatprep.subr.bf16.mxu0 %v1122_v1  ;;  %996 = vmatprep.mubr.bf16.mxu0 %v1129_v4  ;;  %v1125_v7 = vld [vmem:[#allocation5 + $0x20] sm:$0xff]   ;;  %v1133_v8 = vld [vmem:[#allocation7 + $0x10] sm:$0xff]   ;;  %v1126_v9 = vld [vmem:[#allocation5 + $0x28] sm:$0xff]   ;;  %s1277_s30 = scalar_lea.vmem %s1638_s21, 512  ;;  %s1281_s9 = sshll.u32 %s1359_s28, 4  ;;  %s1282_s9 = int_to_ptr.vmem [resolvable:$false] %s1281_s9 }
  0x89   : > { %1001 = vmatpush3.bf16.msra.mxu1 %v1131_v5  ;;  %v1127_v11 = vld [vmem:[#allocation5 + $0x30] sm:$0xff]   ;;  %v1135_v12 = vld [vmem:[#allocation7 + $0x20] sm:$0xff]   ;;  %v1128_v13 = vld [vmem:[#allocation5 + $0x38] sm:$0xff]   ;;  %vm734_vm0 = vcmp.lt.s32.totalorder %v733_v57, 10  ;;  %p1278_p10 = scmp.ne.s32.totalorder %s1638_s21, %s1277_s30  ;;  %s1283_s13 = scalar_lea.vmem %s1282_s9, 1024 }
  0x8a   : > { %1002 = vmatprep.subr.bf16.mxu1 %v1132_v6  ;;  %v1136_v14 = vld [vmem:[#allocation7 + $0x28] sm:$0xff]   ;;  %v1137_v16 = vld [vmem:[#allocation7 + $0x30] sm:$0xff]   ;;  %v1138_v17 = vld [vmem:[#allocation7 + $0x38] sm:$0xff]   ;;  %p1284_p12 = scmp.lt.s32.totalorder %s1638_s21, %s1282_s9  ;;  %p1285_p1 = scmp.lt.s32.totalorder %s1283_s13, %s1277_s30 }
  0x8b   : > { %983 = vmatpush3.bf16.msra.mxu0 %v1122_v1  ;;  %v1130_v15 = vld [vmem:[%s1611_s20 + $0x8] sm:$0xff]   ;;  %v1139_v18 = vld [vmem:[#allocation8] sm:$0xff]   ;;  %v1141_v20 = vld [vmem:[#allocation8 + $0x10] sm:$0xff]   ;;  %s784_s20 = scalar_lea.sflag [#allocation4], %s1607_s17  ;;  %p1279_p3 = pnand %p1278_p10, %p1556_p5 }
  0x8c   : > { %984 = vmatprep.subr.bf16.mxu0 %v1123_v2  ;;  %v1140_v19 = vld [vmem:[#allocation8 + $0x8] sm:$0xff]   ;;  %v1142_v21 = vld [vmem:[#allocation8 + $0x18] sm:$0xff]   ;;  %v1143_v22 = vld [vmem:[#allocation8 + $0x20] sm:$0xff]   ;;  %p1286_p2 = por %p1285_p1, %p1284_p12 }
  0x8d   : > { %1003 = vmatpush3.bf16.msra.mxu1 %v1132_v6  ;;  %v1144_v23 = vld [vmem:[#allocation8 + $0x28] sm:$0xff]   ;;  %v914_v24 = vld [vmem:[%s1689_s2] ss:$0 sm:$0xff]  ;;  %v1145_v39 = vld [vmem:[#allocation8 + $0x30] sm:$0xff]   ;;  %p1280_p7 = pneg %p1279_p3 }
  0x8e   : > { %1004 = vmatprep.subr.bf16.mxu1 %v1133_v8  ;;  %v1146_v40 = vld [vmem:[#allocation8 + $0x38] sm:$0xff]   ;;  %v925_v41 = vld [vmem:[%s1691_s4] ss:$0 sm:$0xff] }
  0x8f   : > { %985 = vmatpush3.bf16.msra.mxu0 %v1123_v2  ;;  %v934_v58 = vld [vmem:[%s1693_s6] ss:$0 sm:$0xff]  ;;  %p1287_p4 = pnand %p1286_p2, %p1280_p7 }
  0x90   : > { %986 = vmatprep.subr.bf16.mxu0 %v1124_v3 }
  0x91   : > { %1005 = vmatpush3.bf16.msra.mxu1 %v1133_v8 }
  0x92   : > { %1006 = vmatprep.subr.bf16.mxu1 %v1134_v10 }
  0x93   : > { %987 = vmatpush3.bf16.msra.mxu0 %v1124_v3 }
  0x94   : > { %988 = vmatprep.subr.bf16.mxu0 %v1125_v7 }
  0x95   : > { %1007 = vmatpush3.bf16.msra.mxu1 %v1134_v10 }
  0x96   : > { %1008 = vmatprep.subr.bf16.mxu1 %v1135_v12 }
  0x97   : > { %989 = vmatpush3.bf16.msra.mxu0 %v1125_v7 }
  0x98   : > { %990 = vmatprep.subr.bf16.mxu0 %v1126_v9 }
  0x99   : > { %1009 = vmatpush3.bf16.msra.mxu1 %v1135_v12 }
  0x9a   : > { %1010 = vmatprep.subr.bf16.mxu1 %v1136_v14 }
  0x9b   : > { %991 = vmatpush3.bf16.msra.mxu0 %v1126_v9 }
  0x9c   : > { %992 = vmatprep.subr.bf16.mxu0 %v1127_v11 }
  0x9d   : > { %1011 = vmatpush3.bf16.msra.mxu1 %v1136_v14 }
  0x9e   : > { %1012 = vmatprep.subr.bf16.mxu1 %v1137_v16 }
  0x9f   : > { %993 = vmatpush3.bf16.msra.mxu0 %v1127_v11 }
  0xa0   : > { %994 = vmatprep.subr.bf16.mxu0 %v1128_v13 }
  0xa1   : > { %1013 = vmatpush3.bf16.msra.mxu1 %v1137_v16 }
  0xa2   : > { %1014 = vmatprep.subr.bf16.mxu1 %v1138_v17 }
  0xa3   : > { %995 = vmatpush3.bf16.msra.mxu0 %v1128_v13 }
  0xa4   : > { %1020 = vmatprep.subr.bf16.mxu0 %v1139_v18 }
  0xa5   : > { %1015 = vmatpush3.bf16.msra.mxu1 %v1138_v17 }
  0xa6   : > { %997 = vmatmul.mubr.bf16.vlgmr.msra.gmra.mrb[0].mxu0 %v1130_v15 }
  0xa7   : > { %1021 = vmatpush3.bf16.msra.mxu0 %v1139_v18 }
  0xa8   : > { %1022 = vmatprep.subr.bf16.mxu0 %v1140_v19 }
  0xab   : > { %1023 = vmatpush3.bf16.msra.mxu0 %v1140_v19 }
  0xac   : > { %1024 = vmatprep.subr.bf16.mxu0 %v1141_v20 }
  0xaf   : > { %1025 = vmatpush3.bf16.msra.mxu0 %v1141_v20 }
  0xb0   : > { %1026 = vmatprep.subr.bf16.mxu0 %v1142_v21 }
  0xb3   : > { %1027 = vmatpush3.bf16.msra.mxu0 %v1142_v21 }
  0xb4   : > { %1028 = vmatprep.subr.bf16.mxu0 %v1143_v22 }
  0xb7   : > { %1029 = vmatpush3.bf16.msra.mxu0 %v1143_v22 }
  0xb8   : > { %1030 = vmatprep.subr.bf16.mxu0 %v1144_v23 }
  0xbb   : > { %1031 = vmatpush3.bf16.msra.mxu0 %v1144_v23 }
  0xbc   : > { %1032 = vmatprep.subr.bf16.mxu0 %v1145_v39 }
  0xbf   : > { %1033 = vmatpush3.bf16.msra.mxu0 %v1145_v39 }
  0xc0   : > { %1034 = vmatprep.subr.bf16.mxu0 %v1146_v40 }
  0xc3   : > { %1035 = vmatpush3.bf16.msra.mxu0 %v1146_v40 }
 0x179   : > { %v998_v25 = vpop.f32.mrb[0].mxu0 }
 0x17a   : > { %v474_v26 = vadd.f32 %v998_v25, %v914_v24  ;;  %v465_v27 = vpop.f32.mrb[1].mxu0 }
 0x17b   : > { %v466_v28 = vadd.f32 %v914_v24, %v465_v27  ;;  %v999_v29 = vpop.f32.mrb[2].mxu0 }
 0x17c   : > { %v477_v30 = vadd.f32 %v999_v29, %v914_v24  ;;  %v468_v31 = vpop.f32.mrb[3].mxu0  ;;  %v482_v33 = vmax.f32 %v474_v26, 0.0 }
 0x17d   : > { %v469_v32 = vadd.f32 %v914_v24, %v468_v31  ;;  %v480_v35 = vmax.f32 %v466_v28, 0.0 }
 0x17e   : > { %v483_v34 = vmax.f32 %v477_v30, 0.0 }
 0x17f   : > { %v481_v36 = vmax.f32 %v469_v32, 0.0 }
 0x180   : > { %v485_v37 = vpack.c.bf16 %v483_v34, %v482_v33 }
 0x181   : > { %v484_v38 = vpack.c.bf16 %v481_v36, %v480_v35 }
 0x183   : > { %1016 = vmatprep.mubr.bf16.mxu1 %v484_v38 }
 0x184   : > { %1017 = vmatmul.mubr.bf16.vlgmr.msra.gmra.mrb[0].mxu1 %v485_v37 }
 0x257   : > { %v1018_v42 = vpop.f32.mrb[0].mxu1 }
 0x258   : > { %v600_v43 = vadd.f32 %v1018_v42, %v925_v41  ;;  %v591_v44 = vpop.f32.mrb[1].mxu1 }
 0x259   : > { %v592_v45 = vadd.f32 %v925_v41, %v591_v44  ;;  %v1019_v46 = vpop.f32.mrb[2].mxu1 }
 0x25a   : > { %v603_v47 = vadd.f32 %v1019_v46, %v925_v41  ;;  %v594_v48 = vpop.f32.mrb[3].mxu1  ;;  %v608_v50 = vmax.f32 %v600_v43, 0.0 }
 0x25b   : > { %v595_v49 = vadd.f32 %v925_v41, %v594_v48  ;;  %v606_v52 = vmax.f32 %v592_v45, 0.0 }
 0x25c   : > { %v609_v51 = vmax.f32 %v603_v47, 0.0 }
 0x25d   : > { %v607_v53 = vmax.f32 %v595_v49, 0.0 }
 0x25e   : > { %v611_v54 = vpack.c.bf16 %v609_v51, %v608_v50 }
 0x25f   : > { %v610_v55 = vpack.c.bf16 %v607_v53, %v606_v52 }
 0x261   : > { %1036 = vmatprep.mubr.bf16.mxu0 %v610_v55 }
 0x262   : > { %1037 = vmatmul.mubr.bf16.vlgmr.msra.gmra.mrb[4].mxu0 %v611_v54 }
 0x335   : > { %v1038_v59 = vpop.f32.mrb[4].mxu0 }
 0x336   : > { %v726_v60 = vadd.f32 %v1038_v59, %v934_v58  ;;  %v717_v61 = vpop.f32.mrb[5].mxu0 }
 0x337   : > { %v718_v62 = vadd.f32 %v934_v58, %v717_v61  ;;  %v1039_v63 = vpop.f32.mrb[6].mxu0 }
 0x338   : > { %v729_v0 = vadd.f32 %v1039_v63, %v934_v58  ;;  %v720_v1 = vpop.f32.mrb[7].mxu0  ;;  %v737_v2 = vsel %vm734_vm0, %v726_v60, -1e+30 }
 0x339   : > { %v721_v3 = vadd.f32 %v934_v58, %v720_v1  ;;  %743 = vmax.xlane.f32.xlu1 %v737_v2  ;;  %v735_v4 = vsel %vm734_vm0, %v718_v62, -1e+30 }
 0x33a   : > { %739 = vmax.xlane.f32.xlu0 %v735_v4  ;;  %v738_v5 = vsel %vm734_vm0, %v729_v0, -1e+30 }
 0x33b   : > { %v736_v6 = vsel %vm734_vm0, %v721_v3, -1e+30 }
 0x33d   : > { %745 = vmax.xlane.f32.xlu1 %v738_v5 }
 0x33e   : > { %741 = vmax.xlane.f32.xlu0 %v736_v6 }
 0x3c6   : > { %v744_v7 = vpop.xlane.xlu1 %743 }
 0x3c7   : > { %v749_v8 = vsub.f32 %v737_v2, %v744_v7  ;;  %v740_v9 = vpop.xlane.xlu0 %739 }
 0x3c8   : > { %v747_v10 = vsub.f32 %v735_v4, %v740_v9 }
 0x3c9   : > { %v755_v13 = vmul.f32 1.442695, %v749_v8 }
 0x3ca   : > { %v751_v11 = vmul.f32 1.442695, %v747_v10  ;;  %v746_v12 = vpop.xlane.xlu1 %745 }
 0x3cb   : > { %v742_v14 = vpop.xlane.xlu0 %741  ;;  %v750_v15 = vsub.f32 %v738_v5, %v746_v12 }
 0x3cc   : > { %1147 = vpow2.f32 %v751_v11  ;;  %v748_v16 = vsub.f32 %v736_v6, %v742_v14 }
 0x3cd   : > { %1149 = vpow2.f32 %v755_v13  ;;  %v757_v18 = vmul.f32 1.442695, %v750_v15 }
 0x3ce   : > { %v753_v17 = vmul.f32 1.442695, %v748_v16 }
 0x3d0   : > { %1151 = vpow2.f32 %v753_v17 }
 0x3d1   : > { %1153 = vpow2.f32 %v757_v18 }
 0x3d6   : > { %v1148_v19 = vpop.eup %1147 }
 0x3d7   : > { %759 = vadd.xlane.f32.xlu0 %v1148_v19  ;;  %v1150_v20 = vpop.eup %1149 }
 0x3da   : > { %v1152_v21 = vpop.eup %1151 }
 0x3db   : > { %763 = vadd.xlane.f32.xlu0 %v1150_v20  ;;  %761 = vadd.xlane.f32.xlu1 %v1152_v21  ;;  %v1154_v22 = vpop.eup %1153 }
 0x3df   : > { %765 = vadd.xlane.f32.xlu1 %v1154_v22 }
 0x464   : > { %v760_v23 = vpop.xlane.xlu0 %759 }
 0x465   : > { %1155 = vlog2.f32 %v760_v23 }
 0x468   : > { %v762_v24 = vpop.xlane.xlu1 %761  ;;  %v764_v25 = vpop.xlane.xlu0 %763 }
 0x469   : > { %1157 = vlog2.f32 %v762_v24 }
 0x46a   : > { %1159 = vlog2.f32 %v764_v25 }
 0x46c   : > { %v766_v26 = vpop.xlane.xlu1 %765 }
 0x46d   : > { %1161 = vlog2.f32 %v766_v26 }
 0x46f   : > { %v1156_v27 = vpop.eup %1155 }
 0x470   : > { %v768_v28 = vmul.f32 0.6931472, %v1156_v27 }
 0x472   : > { %v775_v29 = vsub.f32 %v747_v10, %v768_v28 }
 0x473   : > { %v1158_v30 = vpop.eup %1157 }
 0x474   : > { %v1160_v31 = vpop.eup %1159  ;;  %779 = vst [vmem:[%s340_s12] sm:$0xff] %v775_v29  ;;  %v770_v32 = vmul.f32 0.6931472, %v1158_v30 }
 0x475   : > { %v772_v33 = vmul.f32 0.6931472, %v1160_v31 }
 0x476   : > { %v776_v34 = vsub.f32 %v748_v16, %v770_v32 }
 0x477   : > { %v1162_v35 = vpop.eup %1161  ;;  %v777_v36 = vsub.f32 %v749_v8, %v772_v33 }
 0x478   : > { %780 = vst [vmem:[%s340_s12 + $0x8] sm:$0xff] %v776_v34  ;;  %v774_v37 = vmul.f32 0.6931472, %v1162_v35 }
 0x479   : > { %781 = vst [vmem:[%s340_s12 + $0x10] sm:$0xff] %v777_v36 }
 0x47a   : > { %v778_v38 = vsub.f32 %v750_v15, %v774_v37 }
 0x47c   : > { %782 = vst [vmem:[%s340_s12 + $0x18] sm:$0xff] %v778_v38 }
 0x47d   : > { %1290 = shalt.err (!%p1287_p4)
}
 0x47e   : > { %s1291_s15 = scalar_lea.hbm %s1643_s11, 512  ;;  %s1295_s8 = scalar_lea.hbm %s1694_s7, 1024 }
 0x47f   : > { %p1292_p9 = scmp.ne.s32.totalorder %s1643_s11, %s1291_s15  ;;  %p1296_p8 = scmp.lt.u32.totalorder %s1643_s11, %s1694_s7 }
 0x480   : > { %p1297_p13 = scmp.lt.u32.totalorder %s1295_s8, %s1291_s15  ;;  %p1299_p10 = scmp.lt.u32.totalorder %s1291_s15, %s1643_s11 }
 0x481   : > { %p1293_p0 = pnand %p1292_p9, %p1556_p5 }
 0x482   : > { %p1298_p6 = por %p1297_p13, %p1296_p8 }
 0x483   : > { %p1294_p11 = pneg %p1293_p0 }
 0x484   : > { %p1300_p3 = por %p1299_p10, %p1298_p6 }
 0x486   : > { %p1301_p7 = pnand %p1300_p3, %p1294_p11 }
 0x488   : > { %1304 = shalt.err (!%p1301_p7)
}
 0x489   : > { %s1360_s29 = smov 128   ;;  %s1361_s23 = smov 8  }
 0x48a   : > { %1054 = dma.vmem_to_hbm [thread:$0]  (%p1556_p5), %s1638_s21, 512, %s1643_s11, %s784_s20, %s1360_s29, %s1360_s29, %s1361_s23  }
 0x48b PF: > { %s1714_s30 = sld [smem:[#allocation15_spill]]  ;;  %s812_s28 = sand.u32 1, %s1339_s24  }
 0x48c   : > { %p1716_p1 = scmp.ge.s32.totalorder %s1351_s27, 2  ;;  %s813_s9 = scalar_lea.sflag [#allocation4], %s812_s28 }
 0x491   : > { %p1715_p12 = scmp.ne.s32.totalorder %s1714_s30, 0 }
 0x493   : > { %p1071_p2 = pnand %p1716_p1, %p1715_p12 }
 0x495   : > { %1334 = dma.done.wait (!%p1071_p2), %s813_s9, 512  }
 0x496   : > { %1336 = vsyncadd (!%p1071_p2), %s813_s9, 4294966784  ;;  %p22_p4 = scmp.ge.s32.totalorder %s1542_s22, 4   ;;  %s1717_s24 = smov %s1343_s25 }
 0x497   : > { %s1718_s25 = smov %s1347_s26  ;;  %s1719_s26 = smov %s1552_s18 }
 0x498   : > { %s1720_s27 = smov %s1542_s22  ;;  %24 = sbr.rel (!%p22_p4) target bundleno = 7 (0x7), region = 105 }
 0x49f   :  { %818 = vsyncpa [#allocation3], 1 }
 0x4a0   :  { %820 = vsyncpa [#allocation3 + $0x1], 1 }
 0x4a1   :  { %821 = vsyncpa [#allocation6], 1 }
 0x4a2   :  { %822 = vsyncpa [#allocation9], 1 }
 0x4a3   :  { %823 = vsyncpa [#allocation4], 1 }
 0x4a4   :  { %825 = vsyncpa [#allocation4 + $0x1], 1 }

</bundles_post_ra>
